<compile_context>
chip_gen: v7x
topology: tpu7x:2x2x1
jax: 0.10.0
libtpu: 0.0.40
codegen_flags: <defaults>
</compile_context>

<pallas_src>
import functools

import jax
import jax.numpy as jnp
from jax.experimental import pallas as pl
from jax.experimental.pallas import tpu as pltpu


def _round_up(x, m):
    return ((x + m - 1) // m) * m


def _vmem_limit_bytes():
    """Chip-derived scoped-VMEM budget (safe fallback off-TPU / interpret)."""
    try:
        cap = pltpu.get_tpu_info().vmem_capacity_bytes
        return int(min(cap // 2, 96 * 1024 * 1024))   # 64 MiB on v5e/v6e, 32 on v7x
    except Exception:
        return 32 * 1024 * 1024


def _pick_time_chunk(T, Bp, Hp, vmem_budget, *, cap=64):
    """Largest time chunk whose double-buffered bf16 gi block fits the VMEM
    budget with ~2x slack, capped to bound the unrolled-body size."""
    step_bytes = Bp * 3 * Hp * 2                       # one timestep of bf16 gi
    fit = max(int(vmem_budget) // (4 * step_bytes), 1)
    return max(1, min(cap, T, fit))


def _gru_chunk_kernel(gi_ref, whh_ref, bhn_ref, wfc_ref, bfc_ref,
                      out_ref, h_ref, *, T_total, Tc):
    """One grid step = Tc GRU timesteps.

    gi_ref : (Tc, Bp, 3*Hp) bf16  precomputed x_t @ W_ih^T + b_ih (+ folded
                                  b_hr/b_hz), gates [r|z|n], lane-aligned at Hp
    whh_ref: (Hp, 3*Hp)     f32   recurrent weights (per-gate lane-aligned)
    bhn_ref: (1, Hp)        f32   n-gate hidden bias (must stay inside r*(...))
    wfc_ref: (Hp, Op)       f32   fused final Linear
    bfc_ref: (1, Op)        f32
    out_ref: (Bp, Op)       f32   written once, on the last grid step
    h_ref  : (Bp, Hp)       f32   hidden state carried across grid steps
    """
    c = pl.program_id(0)
    Bp, Hp = h_ref.shape

    @pl.when(c == 0)
    def _():
        h_ref[...] = jnp.zeros_like(h_ref)            # h_0 = 0 (PyTorch default)

    whh = whh_ref[...]                                # hoisted, constant over chunk
    bhn = jnp.broadcast_to(bhn_ref[...], (Bp, Hp))    # broadcast once per chunk

    needs_mask = (T_total % Tc) != 0                  # static Python bool

    def step(t, h):
        gi = gi_ref[t].astype(jnp.float32)            # (Bp, 3Hp), dynamic row
        gh = jnp.dot(h, whh, preferred_element_type=jnp.float32)
        r = jax.nn.sigmoid(gi[:, 0:Hp] + gh[:, 0:Hp])
        z = jax.nn.sigmoid(gi[:, Hp:2 * Hp] + gh[:, Hp:2 * Hp])
        n = jnp.tanh(gi[:, 2 * Hp:3 * Hp] + r * (gh[:, 2 * Hp:3 * Hp] + bhn))
        h_new = n + z * (h - n)                       # == (1-z)*n + z*h
        if needs_mask:                                # only emitted when Tc ∤ T
            valid = (c * Tc + t) < T_total
            h_new = jnp.where(valid, h_new, h)
        return h_new

    # h stays in vregs across the chunk; single VMEM read + write per chunk.
    h = jax.lax.fori_loop(0, Tc, step, h_ref[...], unroll=True)
    h_ref[...] = h

    @pl.when(c == pl.num_programs(0) - 1)
    def _():
        # fc(hidden.squeeze(0)) == fc(output[:, -1, :])
        out_ref[...] = (jnp.dot(h, wfc_ref[...],
                                preferred_element_type=jnp.float32)
                        + bfc_ref[...])


def gru_forward(text, params, *, time_chunk=None):
    """text: (B, T) int32 token ids. Returns (B, output_dim) float32."""
    emb_table = params["embedding"]          # (V, E)
    w_ih_t = params["w_ih_t"]                # (E, 3H)   gates [r|z|n]
    w_hh_t = params["w_hh_t"]                # (H, 3H)
    b_ih = params["b_ih"]                    # (1, 3H)
    b_hh = params["b_hh"]                    # (1, 3H)
    w_fc_t = params["w_fc_t"]                # (H, O)
    b_fc = params["b_fc"]                    # (1, O)

    B, T = text.shape
    H = w_hh_t.shape[0]
    O = w_fc_t.shape[1]

    Bp = _round_up(B, 8)                     # f32 sublane
    Hp = _round_up(H, 128)                   # lane-aligned per-gate width
    Op = _round_up(O, 128)                   # lane-dense FC store

    def pad_gate_cols(w):                    # (..., 3H) -> (..., 3Hp), zeros
        parts = [w[..., k * H:(k + 1) * H] for k in range(3)]
        parts = [jnp.pad(p, [(0, 0)] * (p.ndim - 1) + [(0, Hp - H)])
                 for p in parts]
        return jnp.concatenate(parts, axis=-1)

    # NOTE: the zero padding below is load-bearing — zero-padded W_hh rows/cols,
    # zero-padded gi columns and zero-padded W_fc rows keep the padded hidden
    # lanes at exactly 0 for all time and out of the output.
    w_ih_p = pad_gate_cols(w_ih_t)                                   # (E, 3Hp)
    w_hh_p = pad_gate_cols(jnp.pad(w_hh_t, ((0, Hp - H), (0, 0))))    # (Hp, 3Hp)
    b_ih_p = pad_gate_cols(b_ih)                                     # (1, 3Hp)
    b_hh_p = pad_gate_cols(b_hh)                                     # (1, 3Hp)
    # r/z hidden biases are h-independent -> fold into streamed gi; the n-gate
    # hidden bias must stay inside r*(...) per PyTorch GRU semantics.
    b_fold = b_ih_p + jnp.concatenate(
        [b_hh_p[:, :2 * Hp], jnp.zeros((1, Hp), b_hh_p.dtype)], axis=-1)
    b_hn_p = b_hh_p[:, 2 * Hp:]                                      # (1, Hp)
    w_fc_p = jnp.pad(w_fc_t, ((0, Hp - H), (0, Op - O)))              # (Hp, Op)
    b_fc_p = jnp.pad(b_fc, ((0, 0), (0, Op - O)))                     # (1, Op)

    # Embedding gather (glue, plain JAX) + hoisted input projection for ALL
    # timesteps on the TRUE batch, fused with the time-major transpose.
    # f32 x f32 matmul; result stored bf16 (the only streamed tensor).
    embedded = jnp.take(emb_table, text, axis=0)                      # (B, T, E)
    gi = jnp.einsum('bte,eg->tbg', embedded, w_ih_p,
                    preferred_element_type=jnp.float32) + b_fold      # (T, B, 3Hp)
    gi = gi.astype(jnp.bfloat16)

    vmem_limit = _vmem_limit_bytes()
    weight_bytes = 4 * (w_hh_p.size + w_fc_p.size + b_hn_p.size + b_fc_p.size)
    if time_chunk is None:
        Tc = _pick_time_chunk(T, Bp, Hp, vmem_limit - weight_bytes)
    else:
        Tc = max(1, min(int(time_chunk), T))
    n_chunks = (T + Tc - 1) // Tc
    Tpad = n_chunks * Tc

    gi = jnp.pad(gi, ((0, Tpad - T), (0, Bp - B), (0, 0)))            # (Tpad, Bp, 3Hp)

    kernel = functools.partial(_gru_chunk_kernel, T_total=T, Tc=Tc)

    # Constant-index weights/biases: single-buffered (no pipelining benefit).
    const = lambda shape: pl.BlockSpec(shape, lambda c: (0,) * len(shape),
                                       pipeline_mode=pl.Buffered(1))

    out = pl.pallas_call(
        kernel,
        out_shape=jax.ShapeDtypeStruct((Bp, Op), jnp.float32),
        grid_spec=pltpu.PrefetchScalarGridSpec(
            num_scalar_prefetch=0,
            grid=(n_chunks,),
            in_specs=[
                pl.BlockSpec((Tc, Bp, 3 * Hp), lambda c: (c, 0, 0)),  # gi chunk
                const((Hp, 3 * Hp)),                                  # W_hh^T
                const((1, Hp)),                                       # b_hn
                const((Hp, Op)),                                      # W_fc^T
                const((1, Op)),                                       # b_fc
            ],
            out_specs=pl.BlockSpec((Bp, Op), lambda c: (0, 0)),
            scratch_shapes=[pltpu.VMEM((Bp, Hp), jnp.float32)],
        ),
        compiler_params=pltpu.CompilerParams(
            dimension_semantics=("arbitrary",),       # recurrence over time
            vmem_limit_bytes=vmem_limit,
        ),
    )(gi, w_hh_p, b_hn_p, w_fc_p, b_fc_p)

    return out[:B, :O]


def _reference_forward(text, params):
    """Pure-JAX f32 reference replicating torch.nn.GRU semantics."""
    emb = jnp.take(params["embedding"], text, axis=0)      # (B, T, E)
    H = params["w_hh_t"].shape[0]
    B = text.shape[0]
    h = jnp.zeros((B, H), jnp.float32)
    for t in range(text.shape[1]):
        x = emb[:, t, :]
        gi = x @ params["w_ih_t"] + params["b_ih"]
        gh = h @ params["w_hh_t"] + params["b_hh"]
        r = jax.nn.sigmoid(gi[:, :H] + gh[:, :H])
        z = jax.nn.sigmoid(gi[:, H:2 * H] + gh[:, H:2 * H])
        n = jnp.tanh(gi[:, 2 * H:] + r * gh[:, 2 * H:])
        h = (1.0 - z) * n + z * h
    return h @ params["w_fc_t"] + params["b_fc"]


def make_params(key, vocab, embedding_dim, hidden_dim, output_dim):
    ks = jax.random.split(key, 7)
    scale = 0.1
    emb = scale * jax.random.normal(ks[0], (vocab, embedding_dim), jnp.float32)
    emb = emb.at[0].set(0.0)   # padding_idx=0 row (pretrained padding row)
    w_ih = scale * jax.random.normal(ks[1], (3 * hidden_dim, embedding_dim), jnp.float32)
    w_hh = scale * jax.random.normal(ks[2], (3 * hidden_dim, hidden_dim), jnp.float32)
    b_ih = scale * jax.random.normal(ks[3], (3 * hidden_dim,), jnp.float32)
    b_hh = scale * jax.random.normal(ks[4], (3 * hidden_dim,), jnp.float32)
    w_fc = scale * jax.random.normal(ks[5], (output_dim, hidden_dim), jnp.float32)
    b_fc = scale * jax.random.normal(ks[6], (output_dim,), jnp.float32)
    return {
        "embedding": emb,
        "w_ih_t": w_ih.T,                     # (E, 3H)
        "w_hh_t": w_hh.T,                     # (H, 3H)
        "b_ih": b_ih.reshape(1, -1),          # (1, 3H)
        "b_hh": b_hh.reshape(1, -1),          # (1, 3H)
        "w_fc_t": w_fc.T,                     # (H, O)
        "b_fc": b_fc.reshape(1, -1),          # (1, O)
    }


if __name__ == "__main__":
    key = jax.random.PRNGKey(0)
    k_param, k_text = jax.random.split(key)

    B, T = 2, 8
    VOCAB, E, HID, OUT = 50, 32, 32, 4

    params = make_params(k_param, VOCAB, E, HID, OUT)
    text = jax.random.randint(k_text, (B, T), 0, VOCAB, dtype=jnp.int32)

    logits = gru_forward(text, params)
    logits = jax.block_until_ready(logits)

    ref = _reference_forward(text, params)
    assert logits.shape == (B, OUT)
    max_err = float(jnp.max(jnp.abs(logits - ref)))
    assert max_err < 2e-2, f"max abs err {max_err}"

    print("KERNEL_OK")
</pallas_src>

<mosaic_0001>
module attributes {stable_mosaic.version = 11 : i64} {
  func.func @_gru_chunk_kernel(%arg0: i32, %arg1: memref<8x8x384xbf16, #tpu.memory_space<vmem>>, %arg2: memref<128x384xf32, #tpu.memory_space<vmem>>, %arg3: memref<1x128xf32, #tpu.memory_space<vmem>>, %arg4: memref<128x128xf32, #tpu.memory_space<vmem>>, %arg5: memref<1x128xf32, #tpu.memory_space<vmem>>, %arg6: memref<8x128xf32, #tpu.memory_space<vmem>>, %arg7: memref<8x128xf32, #tpu.memory_space<vmem>>) attributes {dimension_semantics = [#tpu.dimension_semantics<arbitrary>], iteration_bounds = array<i64: 1>, scalar_prefetch = 0 : i64, scratch_operands = 1 : i64, tpu.core_type = #tpu.core_type<tc>, window_params = [{transform_indices = @transform_0, window_bounds = array<i64: 8, 8, 384>}, {pipeline_mode = #tpu.pipeline_mode<synchronous>, transform_indices = @transform_1, window_bounds = array<i64: 128, 384>}, {pipeline_mode = #tpu.pipeline_mode<synchronous>, transform_indices = @transform_2, window_bounds = array<i64: 1, 128>}, {pipeline_mode = #tpu.pipeline_mode<synchronous>, transform_indices = @transform_3, window_bounds = array<i64: 128, 128>}, {pipeline_mode = #tpu.pipeline_mode<synchronous>, transform_indices = @transform_4, window_bounds = array<i64: 1, 128>}, {pipeline_mode = #tpu.pipeline_mode<synchronous>, transform_indices = @transform_5, window_bounds = array<i64: 8, 128>}]} {
    %c0_i32 = arith.constant 0 : i32
    %0 = arith.cmpi eq, %arg0, %c0_i32 : i32
    %1 = arith.extui %0 : i1 to i32
    %c0_i32_0 = arith.constant 0 : i32
    %2 = arith.cmpi ne, %1, %c0_i32_0 : i32
    scf.if %2 {
      %cst_50 = arith.constant 0.000000e+00 : f32
      %252 = vector.broadcast %cst_50 : f32 to vector<8x128xf32>
      %c0_51 = arith.constant 0 : index
      %c0_52 = arith.constant 0 : index
      %253 = vector.load %arg7[%c0_51, %c0_52] : memref<8x128xf32, #tpu.memory_space<vmem>>, vector<8x128xf32>
      tpu.vector_store %arg7[%c0_51, %c0_52], %252 {strides = array<i32>} : memref<8x128xf32, #tpu.memory_space<vmem>>, vector<8x128xf32>,
    } else {
    }
    %c0 = arith.constant 0 : index
    %c0_1 = arith.constant 0 : index
    %3 = vector.load %arg2[%c0, %c0_1] : memref<128x384xf32, #tpu.memory_space<vmem>>, vector<128x384xf32>
    %c0_2 = arith.constant 0 : index
    %c0_3 = arith.constant 0 : index
    %4 = vector.load %arg3[%c0_2, %c0_3] : memref<1x128xf32, #tpu.memory_space<vmem>>, vector<1x128xf32>
    %5 = vector.shape_cast %4 : vector<1x128xf32> to vector<1x128xf32>
    %6 = vector.broadcast %5 : vector<1x128xf32> to vector<8x128xf32>
    %c0_4 = arith.constant 0 : index
    %c0_5 = arith.constant 0 : index
    %7 = vector.load %arg7[%c0_4, %c0_5] : memref<8x128xf32, #tpu.memory_space<vmem>>, vector<8x128xf32>
    %c0_i32_6 = arith.constant 0 : i32
    %8 = arith.index_cast %c0_i32_6 : i32 to index
    %c0_7 = arith.constant 0 : index
    %c0_8 = arith.constant 0 : index
    %9 = vector.load %arg1[%8, %c0_7, %c0_8] : memref<8x8x384xbf16, #tpu.memory_space<vmem>>, vector<1x8x384xbf16>
    %10 = vector.shape_cast %9 : vector<1x8x384xbf16> to vector<8x384xbf16>
    %11 = arith.extf %10 : vector<8x384xbf16> to vector<8x384xf32>
    %cst = arith.constant dense<0.000000e+00> : vector<8x384xf32>
    %12 = tpu.matmul %7, %3, %cst {dimension_numbers = #tpu.dot_dimension_numbers<[1], [0], [0], [1], [0, 0, 1, 1], [], []>} : vector<8x128xf32>, vector<128x384xf32>, vector<8x384xf32> -> vector<8x384xf32>
    %13 = vector.extract_strided_slice %11 {offsets = [0, 0], sizes = [8, 128], strides = [1, 1]} : vector<8x384xf32> to vector<8x128xf32>
    %14 = vector.extract_strided_slice %12 {offsets = [0, 0], sizes = [8, 128], strides = [1, 1]} : vector<8x384xf32> to vector<8x128xf32>
    %15 = arith.addf %13, %14 : vector<8x128xf32>
    %16 = arith.negf %15 : vector<8x128xf32>
    %17 = math.exp %16 : vector<8x128xf32>
    %cst_9 = arith.constant 1.000000e+00 : f32
    %18 = vector.broadcast %cst_9 : f32 to vector<8x128xf32>
    %19 = arith.addf %18, %17 : vector<8x128xf32>
    %20 = arith.divf %18, %19 : vector<8x128xf32>
    %21 = vector.extract_strided_slice %11 {offsets = [0, 128], sizes = [8, 128], strides = [1, 1]} : vector<8x384xf32> to vector<8x128xf32>
    %22 = vector.extract_strided_slice %12 {offsets = [0, 128], sizes = [8, 128], strides = [1, 1]} : vector<8x384xf32> to vector<8x128xf32>
    %23 = arith.addf %21, %22 : vector<8x128xf32>
    %24 = arith.negf %23 : vector<8x128xf32>
    %25 = math.exp %24 : vector<8x128xf32>
    %cst_10 = arith.constant 1.000000e+00 : f32
    %26 = vector.broadcast %cst_10 : f32 to vector<8x128xf32>
    %27 = arith.addf %26, %25 : vector<8x128xf32>
    %28 = arith.divf %26, %27 : vector<8x128xf32>
    %29 = vector.extract_strided_slice %11 {offsets = [0, 256], sizes = [8, 128], strides = [1, 1]} : vector<8x384xf32> to vector<8x128xf32>
    %30 = vector.extract_strided_slice %12 {offsets = [0, 256], sizes = [8, 128], strides = [1, 1]} : vector<8x384xf32> to vector<8x128xf32>
    %31 = arith.addf %30, %6 : vector<8x128xf32>
    %32 = arith.mulf %20, %31 : vector<8x128xf32>
    %33 = arith.addf %29, %32 : vector<8x128xf32>
    %34 = math.tanh %33 : vector<8x128xf32>
    %35 = arith.subf %7, %34 : vector<8x128xf32>
    %36 = arith.mulf %28, %35 : vector<8x128xf32>
    %37 = arith.addf %34, %36 : vector<8x128xf32>
    %c1_i32 = arith.constant 1 : i32
    %38 = arith.index_cast %c1_i32 : i32 to index
    %c0_11 = arith.constant 0 : index
    %c0_12 = arith.constant 0 : index
    %39 = vector.load %arg1[%38, %c0_11, %c0_12] : memref<8x8x384xbf16, #tpu.memory_space<vmem>>, vector<1x8x384xbf16>
    %40 = vector.shape_cast %39 : vector<1x8x384xbf16> to vector<8x384xbf16>
    %41 = arith.extf %40 : vector<8x384xbf16> to vector<8x384xf32>
    %cst_13 = arith.constant dense<0.000000e+00> : vector<8x384xf32>
    %42 = tpu.matmul %37, %3, %cst_13 {dimension_numbers = #tpu.dot_dimension_numbers<[1], [0], [0], [1], [0, 0, 1, 1], [], []>} : vector<8x128xf32>, vector<128x384xf32>, vector<8x384xf32> -> vector<8x384xf32>
    %43 = vector.extract_strided_slice %41 {offsets = [0, 0], sizes = [8, 128], strides = [1, 1]} : vector<8x384xf32> to vector<8x128xf32>
    %44 = vector.extract_strided_slice %42 {offsets = [0, 0], sizes = [8, 128], strides = [1, 1]} : vector<8x384xf32> to vector<8x128xf32>
    %45 = arith.addf %43, %44 : vector<8x128xf32>
    %46 = arith.negf %45 : vector<8x128xf32>
    %47 = math.exp %46 : vector<8x128xf32>
    %cst_14 = arith.constant 1.000000e+00 : f32
    %48 = vector.broadcast %cst_14 : f32 to vector<8x128xf32>
    %49 = arith.addf %48, %47 : vector<8x128xf32>
    %50 = arith.divf %48, %49 : vector<8x128xf32>
    %51 = vector.extract_strided_slice %41 {offsets = [0, 128], sizes = [8, 128], strides = [1, 1]} : vector<8x384xf32> to vector<8x128xf32>
    %52 = vector.extract_strided_slice %42 {offsets = [0, 128], sizes = [8, 128], strides = [1, 1]} : vector<8x384xf32> to vector<8x128xf32>
    %53 = arith.addf %51, %52 : vector<8x128xf32>
    %54 = arith.negf %53 : vector<8x128xf32>
    %55 = math.exp %54 : vector<8x128xf32>
    %cst_15 = arith.constant 1.000000e+00 : f32
    %56 = vector.broadcast %cst_15 : f32 to vector<8x128xf32>
    %57 = arith.addf %56, %55 : vector<8x128xf32>
    %58 = arith.divf %56, %57 : vector<8x128xf32>
    %59 = vector.extract_strided_slice %41 {offsets = [0, 256], sizes = [8, 128], strides = [1, 1]} : vector<8x384xf32> to vector<8x128xf32>
    %60 = vector.extract_strided_slice %42 {offsets = [0, 256], sizes = [8, 128], strides = [1, 1]} : vector<8x384xf32> to vector<8x128xf32>
    %61 = arith.addf %60, %6 : vector<8x128xf32>
    %62 = arith.mulf %50, %61 : vector<8x128xf32>
    %63 = arith.addf %59, %62 : vector<8x128xf32>
    %64 = math.tanh %63 : vector<8x128xf32>
    %65 = arith.subf %37, %64 : vector<8x128xf32>
    %66 = arith.mulf %58, %65 : vector<8x128xf32>
    %67 = arith.addf %64, %66 : vector<8x128xf32>
    %c2_i32 = arith.constant 2 : i32
    %68 = arith.index_cast %c2_i32 : i32 to index
    %c0_16 = arith.constant 0 : index
    %c0_17 = arith.constant 0 : index
    %69 = vector.load %arg1[%68, %c0_16, %c0_17] : memref<8x8x384xbf16, #tpu.memory_space<vmem>>, vector<1x8x384xbf16>
    %70 = vector.shape_cast %69 : vector<1x8x384xbf16> to vector<8x384xbf16>
    %71 = arith.extf %70 : vector<8x384xbf16> to vector<8x384xf32>
    %cst_18 = arith.constant dense<0.000000e+00> : vector<8x384xf32>
    %72 = tpu.matmul %67, %3, %cst_18 {dimension_numbers = #tpu.dot_dimension_numbers<[1], [0], [0], [1], [0, 0, 1, 1], [], []>} : vector<8x128xf32>, vector<128x384xf32>, vector<8x384xf32> -> vector<8x384xf32>
    %73 = vector.extract_strided_slice %71 {offsets = [0, 0], sizes = [8, 128], strides = [1, 1]} : vector<8x384xf32> to vector<8x128xf32>
    %74 = vector.extract_strided_slice %72 {offsets = [0, 0], sizes = [8, 128], strides = [1, 1]} : vector<8x384xf32> to vector<8x128xf32>
    %75 = arith.addf %73, %74 : vector<8x128xf32>
    %76 = arith.negf %75 : vector<8x128xf32>
    %77 = math.exp %76 : vector<8x128xf32>
    %cst_19 = arith.constant 1.000000e+00 : f32
    %78 = vector.broadcast %cst_19 : f32 to vector<8x128xf32>
    %79 = arith.addf %78, %77 : vector<8x128xf32>
    %80 = arith.divf %78, %79 : vector<8x128xf32>
    %81 = vector.extract_strided_slice %71 {offsets = [0, 128], sizes = [8, 128], strides = [1, 1]} : vector<8x384xf32> to vector<8x128xf32>
    %82 = vector.extract_strided_slice %72 {offsets = [0, 128], sizes = [8, 128], strides = [1, 1]} : vector<8x384xf32> to vector<8x128xf32>
    %83 = arith.addf %81, %82 : vector<8x128xf32>
    %84 = arith.negf %83 : vector<8x128xf32>
    %85 = math.exp %84 : vector<8x128xf32>
    %cst_20 = arith.constant 1.000000e+00 : f32
    %86 = vector.broadcast %cst_20 : f32 to vector<8x128xf32>
    %87 = arith.addf %86, %85 : vector<8x128xf32>
    %88 = arith.divf %86, %87 : vector<8x128xf32>
    %89 = vector.extract_strided_slice %71 {offsets = [0, 256], sizes = [8, 128], strides = [1, 1]} : vector<8x384xf32> to vector<8x128xf32>
    %90 = vector.extract_strided_slice %72 {offsets = [0, 256], sizes = [8, 128], strides = [1, 1]} : vector<8x384xf32> to vector<8x128xf32>
    %91 = arith.addf %90, %6 : vector<8x128xf32>
    %92 = arith.mulf %80, %91 : vector<8x128xf32>
    %93 = arith.addf %89, %92 : vector<8x128xf32>
    %94 = math.tanh %93 : vector<8x128xf32>
    %95 = arith.subf %67, %94 : vector<8x128xf32>
    %96 = arith.mulf %88, %95 : vector<8x128xf32>
    %97 = arith.addf %94, %96 : vector<8x128xf32>
    %c3_i32 = arith.constant 3 : i32
    %98 = arith.index_cast %c3_i32 : i32 to index
    %c0_21 = arith.constant 0 : index
    %c0_22 = arith.constant 0 : index
    %99 = vector.load %arg1[%98, %c0_21, %c0_22] : memref<8x8x384xbf16, #tpu.memory_space<vmem>>, vector<1x8x384xbf16>
    %100 = vector.shape_cast %99 : vector<1x8x384xbf16> to vector<8x384xbf16>
    %101 = arith.extf %100 : vector<8x384xbf16> to vector<8x384xf32>
    %cst_23 = arith.constant dense<0.000000e+00> : vector<8x384xf32>
    %102 = tpu.matmul %97, %3, %cst_23 {dimension_numbers = #tpu.dot_dimension_numbers<[1], [0], [0], [1], [0, 0, 1, 1], [], []>} : vector<8x128xf32>, vector<128x384xf32>, vector<8x384xf32> -> vector<8x384xf32>
    %103 = vector.extract_strided_slice %101 {offsets = [0, 0], sizes = [8, 128], strides = [1, 1]} : vector<8x384xf32> to vector<8x128xf32>
    %104 = vector.extract_strided_slice %102 {offsets = [0, 0], sizes = [8, 128], strides = [1, 1]} : vector<8x384xf32> to vector<8x128xf32>
    %105 = arith.addf %103, %104 : vector<8x128xf32>
    %106 = arith.negf %105 : vector<8x128xf32>
    %107 = math.exp %106 : vector<8x128xf32>
    %cst_24 = arith.constant 1.000000e+00 : f32
    %108 = vector.broadcast %cst_24 : f32 to vector<8x128xf32>
    %109 = arith.addf %108, %107 : vector<8x128xf32>
    %110 = arith.divf %108, %109 : vector<8x128xf32>
    %111 = vector.extract_strided_slice %101 {offsets = [0, 128], sizes = [8, 128], strides = [1, 1]} : vector<8x384xf32> to vector<8x128xf32>
    %112 = vector.extract_strided_slice %102 {offsets = [0, 128], sizes = [8, 128], strides = [1, 1]} : vector<8x384xf32> to vector<8x128xf32>
    %113 = arith.addf %111, %112 : vector<8x128xf32>
    %114 = arith.negf %113 : vector<8x128xf32>
    %115 = math.exp %114 : vector<8x128xf32>
    %cst_25 = arith.constant 1.000000e+00 : f32
    %116 = vector.broadcast %cst_25 : f32 to vector<8x128xf32>
    %117 = arith.addf %116, %115 : vector<8x128xf32>
    %118 = arith.divf %116, %117 : vector<8x128xf32>
    %119 = vector.extract_strided_slice %101 {offsets = [0, 256], sizes = [8, 128], strides = [1, 1]} : vector<8x384xf32> to vector<8x128xf32>
    %120 = vector.extract_strided_slice %102 {offsets = [0, 256], sizes = [8, 128], strides = [1, 1]} : vector<8x384xf32> to vector<8x128xf32>
    %121 = arith.addf %120, %6 : vector<8x128xf32>
    %122 = arith.mulf %110, %121 : vector<8x128xf32>
    %123 = arith.addf %119, %122 : vector<8x128xf32>
    %124 = math.tanh %123 : vector<8x128xf32>
    %125 = arith.subf %97, %124 : vector<8x128xf32>
    %126 = arith.mulf %118, %125 : vector<8x128xf32>
    %127 = arith.addf %124, %126 : vector<8x128xf32>
    %c4_i32 = arith.constant 4 : i32
    %128 = arith.index_cast %c4_i32 : i32 to index
    %c0_26 = arith.constant 0 : index
    %c0_27 = arith.constant 0 : index
    %129 = vector.load %arg1[%128, %c0_26, %c0_27] : memref<8x8x384xbf16, #tpu.memory_space<vmem>>, vector<1x8x384xbf16>
    %130 = vector.shape_cast %129 : vector<1x8x384xbf16> to vector<8x384xbf16>
    %131 = arith.extf %130 : vector<8x384xbf16> to vector<8x384xf32>
    %cst_28 = arith.constant dense<0.000000e+00> : vector<8x384xf32>
    %132 = tpu.matmul %127, %3, %cst_28 {dimension_numbers = #tpu.dot_dimension_numbers<[1], [0], [0], [1], [0, 0, 1, 1], [], []>} : vector<8x128xf32>, vector<128x384xf32>, vector<8x384xf32> -> vector<8x384xf32>
    %133 = vector.extract_strided_slice %131 {offsets = [0, 0], sizes = [8, 128], strides = [1, 1]} : vector<8x384xf32> to vector<8x128xf32>
    %134 = vector.extract_strided_slice %132 {offsets = [0, 0], sizes = [8, 128], strides = [1, 1]} : vector<8x384xf32> to vector<8x128xf32>
    %135 = arith.addf %133, %134 : vector<8x128xf32>
    %136 = arith.negf %135 : vector<8x128xf32>
    %137 = math.exp %136 : vector<8x128xf32>
    %cst_29 = arith.constant 1.000000e+00 : f32
    %138 = vector.broadcast %cst_29 : f32 to vector<8x128xf32>
    %139 = arith.addf %138, %137 : vector<8x128xf32>
    %140 = arith.divf %138, %139 : vector<8x128xf32>
    %141 = vector.extract_strided_slice %131 {offsets = [0, 128], sizes = [8, 128], strides = [1, 1]} : vector<8x384xf32> to vector<8x128xf32>
    %142 = vector.extract_strided_slice %132 {offsets = [0, 128], sizes = [8, 128], strides = [1, 1]} : vector<8x384xf32> to vector<8x128xf32>
    %143 = arith.addf %141, %142 : vector<8x128xf32>
    %144 = arith.negf %143 : vector<8x128xf32>
    %145 = math.exp %144 : vector<8x128xf32>
    %cst_30 = arith.constant 1.000000e+00 : f32
    %146 = vector.broadcast %cst_30 : f32 to vector<8x128xf32>
    %147 = arith.addf %146, %145 : vector<8x128xf32>
    %148 = arith.divf %146, %147 : vector<8x128xf32>
    %149 = vector.extract_strided_slice %131 {offsets = [0, 256], sizes = [8, 128], strides = [1, 1]} : vector<8x384xf32> to vector<8x128xf32>
    %150 = vector.extract_strided_slice %132 {offsets = [0, 256], sizes = [8, 128], strides = [1, 1]} : vector<8x384xf32> to vector<8x128xf32>
    %151 = arith.addf %150, %6 : vector<8x128xf32>
    %152 = arith.mulf %140, %151 : vector<8x128xf32>
    %153 = arith.addf %149, %152 : vector<8x128xf32>
    %154 = math.tanh %153 : vector<8x128xf32>
    %155 = arith.subf %127, %154 : vector<8x128xf32>
    %156 = arith.mulf %148, %155 : vector<8x128xf32>
    %157 = arith.addf %154, %156 : vector<8x128xf32>
    %c5_i32 = arith.constant 5 : i32
    %158 = arith.index_cast %c5_i32 : i32 to index
    %c0_31 = arith.constant 0 : index
    %c0_32 = arith.constant 0 : index
    %159 = vector.load %arg1[%158, %c0_31, %c0_32] : memref<8x8x384xbf16, #tpu.memory_space<vmem>>, vector<1x8x384xbf16>
    %160 = vector.shape_cast %159 : vector<1x8x384xbf16> to vector<8x384xbf16>
    %161 = arith.extf %160 : vector<8x384xbf16> to vector<8x384xf32>
    %cst_33 = arith.constant dense<0.000000e+00> : vector<8x384xf32>
    %162 = tpu.matmul %157, %3, %cst_33 {dimension_numbers = #tpu.dot_dimension_numbers<[1], [0], [0], [1], [0, 0, 1, 1], [], []>} : vector<8x128xf32>, vector<128x384xf32>, vector<8x384xf32> -> vector<8x384xf32>
    %163 = vector.extract_strided_slice %161 {offsets = [0, 0], sizes = [8, 128], strides = [1, 1]} : vector<8x384xf32> to vector<8x128xf32>
    %164 = vector.extract_strided_slice %162 {offsets = [0, 0], sizes = [8, 128], strides = [1, 1]} : vector<8x384xf32> to vector<8x128xf32>
    %165 = arith.addf %163, %164 : vector<8x128xf32>
    %166 = arith.negf %165 : vector<8x128xf32>
    %167 = math.exp %166 : vector<8x128xf32>
    %cst_34 = arith.constant 1.000000e+00 : f32
    %168 = vector.broadcast %cst_34 : f32 to vector<8x128xf32>
    %169 = arith.addf %168, %167 : vector<8x128xf32>
    %170 = arith.divf %168, %169 : vector<8x128xf32>
    %171 = vector.extract_strided_slice %161 {offsets = [0, 128], sizes = [8, 128], strides = [1, 1]} : vector<8x384xf32> to vector<8x128xf32>
    %172 = vector.extract_strided_slice %162 {offsets = [0, 128], sizes = [8, 128], strides = [1, 1]} : vector<8x384xf32> to vector<8x128xf32>
    %173 = arith.addf %171, %172 : vector<8x128xf32>
    %174 = arith.negf %173 : vector<8x128xf32>
    %175 = math.exp %174 : vector<8x128xf32>
    %cst_35 = arith.constant 1.000000e+00 : f32
    %176 = vector.broadcast %cst_35 : f32 to vector<8x128xf32>
    %177 = arith.addf %176, %175 : vector<8x128xf32>
    %178 = arith.divf %176, %177 : vector<8x128xf32>
    %179 = vector.extract_strided_slice %161 {offsets = [0, 256], sizes = [8, 128], strides = [1, 1]} : vector<8x384xf32> to vector<8x128xf32>
    %180 = vector.extract_strided_slice %162 {offsets = [0, 256], sizes = [8, 128], strides = [1, 1]} : vector<8x384xf32> to vector<8x128xf32>
    %181 = arith.addf %180, %6 : vector<8x128xf32>
    %182 = arith.mulf %170, %181 : vector<8x128xf32>
    %183 = arith.addf %179, %182 : vector<8x128xf32>
    %184 = math.tanh %183 : vector<8x128xf32>
    %185 = arith.subf %157, %184 : vector<8x128xf32>
    %186 = arith.mulf %178, %185 : vector<8x128xf32>
    %187 = arith.addf %184, %186 : vector<8x128xf32>
    %c6_i32 = arith.constant 6 : i32
    %188 = arith.index_cast %c6_i32 : i32 to index
    %c0_36 = arith.constant 0 : index
    %c0_37 = arith.constant 0 : index
    %189 = vector.load %arg1[%188, %c0_36, %c0_37] : memref<8x8x384xbf16, #tpu.memory_space<vmem>>, vector<1x8x384xbf16>
    %190 = vector.shape_cast %189 : vector<1x8x384xbf16> to vector<8x384xbf16>
    %191 = arith.extf %190 : vector<8x384xbf16> to vector<8x384xf32>
    %cst_38 = arith.constant dense<0.000000e+00> : vector<8x384xf32>
    %192 = tpu.matmul %187, %3, %cst_38 {dimension_numbers = #tpu.dot_dimension_numbers<[1], [0], [0], [1], [0, 0, 1, 1], [], []>} : vector<8x128xf32>, vector<128x384xf32>, vector<8x384xf32> -> vector<8x384xf32>
    %193 = vector.extract_strided_slice %191 {offsets = [0, 0], sizes = [8, 128], strides = [1, 1]} : vector<8x384xf32> to vector<8x128xf32>
    %194 = vector.extract_strided_slice %192 {offsets = [0, 0], sizes = [8, 128], strides = [1, 1]} : vector<8x384xf32> to vector<8x128xf32>
    %195 = arith.addf %193, %194 : vector<8x128xf32>
    %196 = arith.negf %195 : vector<8x128xf32>
    %197 = math.exp %196 : vector<8x128xf32>
    %cst_39 = arith.constant 1.000000e+00 : f32
    %198 = vector.broadcast %cst_39 : f32 to vector<8x128xf32>
    %199 = arith.addf %198, %197 : vector<8x128xf32>
    %200 = arith.divf %198, %199 : vector<8x128xf32>
    %201 = vector.extract_strided_slice %191 {offsets = [0, 128], sizes = [8, 128], strides = [1, 1]} : vector<8x384xf32> to vector<8x128xf32>
    %202 = vector.extract_strided_slice %192 {offsets = [0, 128], sizes = [8, 128], strides = [1, 1]} : vector<8x384xf32> to vector<8x128xf32>
    %203 = arith.addf %201, %202 : vector<8x128xf32>
    %204 = arith.negf %203 : vector<8x128xf32>
    %205 = math.exp %204 : vector<8x128xf32>
    %cst_40 = arith.constant 1.000000e+00 : f32
    %206 = vector.broadcast %cst_40 : f32 to vector<8x128xf32>
    %207 = arith.addf %206, %205 : vector<8x128xf32>
    %208 = arith.divf %206, %207 : vector<8x128xf32>
    %209 = vector.extract_strided_slice %191 {offsets = [0, 256], sizes = [8, 128], strides = [1, 1]} : vector<8x384xf32> to vector<8x128xf32>
    %210 = vector.extract_strided_slice %192 {offsets = [0, 256], sizes = [8, 128], strides = [1, 1]} : vector<8x384xf32> to vector<8x128xf32>
    %211 = arith.addf %210, %6 : vector<8x128xf32>
    %212 = arith.mulf %200, %211 : vector<8x128xf32>
    %213 = arith.addf %209, %212 : vector<8x128xf32>
    %214 = math.tanh %213 : vector<8x128xf32>
    %215 = arith.subf %187, %214 : vector<8x128xf32>
    %216 = arith.mulf %208, %215 : vector<8x128xf32>
    %217 = arith.addf %214, %216 : vector<8x128xf32>
    %c7_i32 = arith.constant 7 : i32
    %218 = arith.index_cast %c7_i32 : i32 to index
    %c0_41 = arith.constant 0 : index
    %c0_42 = arith.constant 0 : index
    %219 = vector.load %arg1[%218, %c0_41, %c0_42] : memref<8x8x384xbf16, #tpu.memory_space<vmem>>, vector<1x8x384xbf16>
    %220 = vector.shape_cast %219 : vector<1x8x384xbf16> to vector<8x384xbf16>
    %221 = arith.extf %220 : vector<8x384xbf16> to vector<8x384xf32>
    %cst_43 = arith.constant dense<0.000000e+00> : vector<8x384xf32>
    %222 = tpu.matmul %217, %3, %cst_43 {dimension_numbers = #tpu.dot_dimension_numbers<[1], [0], [0], [1], [0, 0, 1, 1], [], []>} : vector<8x128xf32>, vector<128x384xf32>, vector<8x384xf32> -> vector<8x384xf32>
    %223 = vector.extract_strided_slice %221 {offsets = [0, 0], sizes = [8, 128], strides = [1, 1]} : vector<8x384xf32> to vector<8x128xf32>
    %224 = vector.extract_strided_slice %222 {offsets = [0, 0], sizes = [8, 128], strides = [1, 1]} : vector<8x384xf32> to vector<8x128xf32>
    %225 = arith.addf %223, %224 : vector<8x128xf32>
    %226 = arith.negf %225 : vector<8x128xf32>
    %227 = math.exp %226 : vector<8x128xf32>
    %cst_44 = arith.constant 1.000000e+00 : f32
    %228 = vector.broadcast %cst_44 : f32 to vector<8x128xf32>
    %229 = arith.addf %228, %227 : vector<8x128xf32>
    %230 = arith.divf %228, %229 : vector<8x128xf32>
    %231 = vector.extract_strided_slice %221 {offsets = [0, 128], sizes = [8, 128], strides = [1, 1]} : vector<8x384xf32> to vector<8x128xf32>
    %232 = vector.extract_strided_slice %222 {offsets = [0, 128], sizes = [8, 128], strides = [1, 1]} : vector<8x384xf32> to vector<8x128xf32>
    %233 = arith.addf %231, %232 : vector<8x128xf32>
    %234 = arith.negf %233 : vector<8x128xf32>
    %235 = math.exp %234 : vector<8x128xf32>
    %cst_45 = arith.constant 1.000000e+00 : f32
    %236 = vector.broadcast %cst_45 : f32 to vector<8x128xf32>
    %237 = arith.addf %236, %235 : vector<8x128xf32>
    %238 = arith.divf %236, %237 : vector<8x128xf32>
    %239 = vector.extract_strided_slice %221 {offsets = [0, 256], sizes = [8, 128], strides = [1, 1]} : vector<8x384xf32> to vector<8x128xf32>
    %240 = vector.extract_strided_slice %222 {offsets = [0, 256], sizes = [8, 128], strides = [1, 1]} : vector<8x384xf32> to vector<8x128xf32>
    %241 = arith.addf %240, %6 : vector<8x128xf32>
    %242 = arith.mulf %230, %241 : vector<8x128xf32>
    %243 = arith.addf %239, %242 : vector<8x128xf32>
    %244 = math.tanh %243 : vector<8x128xf32>
    %245 = arith.subf %217, %244 : vector<8x128xf32>
    %246 = arith.mulf %238, %245 : vector<8x128xf32>
    %247 = arith.addf %244, %246 : vector<8x128xf32>
    %c8_i32 = arith.constant 8 : i32
    %c0_46 = arith.constant 0 : index
    %c0_47 = arith.constant 0 : index
    %248 = vector.load %arg7[%c0_46, %c0_47] : memref<8x128xf32, #tpu.memory_space<vmem>>, vector<8x128xf32>
    tpu.vector_store %arg7[%c0_46, %c0_47], %247 {strides = array<i32>} : memref<8x128xf32, #tpu.memory_space<vmem>>, vector<8x128xf32>,
    %c0_i32_48 = arith.constant 0 : i32
    %249 = arith.cmpi eq, %arg0, %c0_i32_48 : i32
    %250 = arith.extui %249 : i1 to i32
    %c0_i32_49 = arith.constant 0 : i32
    %251 = arith.cmpi ne, %250, %c0_i32_49 : i32
    scf.if %251 {
      %c0_50 = arith.constant 0 : index
      %c0_51 = arith.constant 0 : index
      %252 = vector.load %arg4[%c0_50, %c0_51] : memref<128x128xf32, #tpu.memory_space<vmem>>, vector<128x128xf32>
      %cst_52 = arith.constant dense<0.000000e+00> : vector<8x128xf32>
      %253 = tpu.matmul %247, %252, %cst_52 {dimension_numbers = #tpu.dot_dimension_numbers<[1], [0], [0], [1], [0, 0, 1, 1], [], []>} : vector<8x128xf32>, vector<128x128xf32>, vector<8x128xf32> -> vector<8x128xf32>
      %c0_53 = arith.constant 0 : index
      %c0_54 = arith.constant 0 : index
      %254 = vector.load %arg5[%c0_53, %c0_54] : memref<1x128xf32, #tpu.memory_space<vmem>>, vector<1x128xf32>
      %255 = vector.broadcast %254 : vector<1x128xf32> to vector<8x128xf32>
      %256 = arith.addf %253, %255 : vector<8x128xf32>
      %c0_55 = arith.constant 0 : index
      %c0_56 = arith.constant 0 : index
      %257 = vector.load %arg6[%c0_55, %c0_56] : memref<8x128xf32, #tpu.memory_space<vmem>>, vector<8x128xf32>
      tpu.vector_store %arg6[%c0_55, %c0_56], %256 {strides = array<i32>} : memref<8x128xf32, #tpu.memory_space<vmem>>, vector<8x128xf32>,
    } else {
    }
    return
  }
  func.func @transform_0(%arg0: i32) -> (i32, i32, i32) {
    %c0_i32 = arith.constant 0 : i32
    %c0_i32_0 = arith.constant 0 : i32
    %c0_i32_1 = arith.constant 0 : i32
    return %arg0, %c0_i32, %c0_i32_0 : i32, i32, i32
  }
  func.func @transform_1(%arg0: i32) -> (i32, i32) {
    %c0_i32 = arith.constant 0 : i32
    %c0_i32_0 = arith.constant 0 : i32
    %c0_i32_1 = arith.constant 0 : i32
    return %c0_i32, %c0_i32_0 : i32, i32
  }
  func.func @transform_2(%arg0: i32) -> (i32, i32) {
    %c0_i32 = arith.constant 0 : i32
    %c0_i32_0 = arith.constant 0 : i32
    %c0_i32_1 = arith.constant 0 : i32
    return %c0_i32, %c0_i32_0 : i32, i32
  }
  func.func @transform_3(%arg0: i32) -> (i32, i32) {
    %c0_i32 = arith.constant 0 : i32
    %c0_i32_0 = arith.constant 0 : i32
    %c0_i32_1 = arith.constant 0 : i32
    return %c0_i32, %c0_i32_0 : i32, i32
  }
  func.func @transform_4(%arg0: i32) -> (i32, i32) {
    %c0_i32 = arith.constant 0 : i32
    %c0_i32_0 = arith.constant 0 : i32
    %c0_i32_1 = arith.constant 0 : i32
    return %c0_i32, %c0_i32_0 : i32, i32
  }
  func.func @transform_5(%arg0: i32) -> (i32, i32) {
    %c0_i32 = arith.constant 0 : i32
    %c0_i32_0 = arith.constant 0 : i32
    %c0_i32_1 = arith.constant 0 : i32
    return %c0_i32, %c0_i32_0 : i32, i32
  }
}

</mosaic_0001>

<bundles_post_ra>
// kernel: tpu_custom_call.1
= control target key start
LH: loop header
LB: loop body
LE: loop exit
PB: predicated region body
PF: predicated region fallthrough
CT: control target
= control target key end

     0   :  { %10 = vsyncpa [#allocation4], 0  ;;  %s3223_s0 = inlined_call_operand.hbm [shape: bf16[8,8,384], index: 0, kind: input, shape index: {}]   ;;  %s3224_s1 = inlined_call_operand.hbm [shape: f32[128,384], index: 1, kind: input, shape index: {}]   ;;  %s3225_s2 = inlined_call_operand.vmem [shape: f32[1,128], index: 2, kind: input, shape index: {}]   ;;  %s3226_s3 = inlined_call_operand.hbm [shape: f32[128,128], index: 3, kind: input, shape index: {}]   ;;  %s3227_s4 = inlined_call_operand.vmem [shape: f32[1,128], index: 4, kind: input, shape index: {}]   ;;  %s3228_s5 = inlined_call_operand.hbm [shape: f32[8,128], index: 5, kind: output, shape index: {}]  }
   0x1   :  { %11 = vsyncpa [#allocation7], 0 }
   0x2   :  { %12 = vsyncpa [#allocation5], 0  ;;  %s2725_s18 = smov [#allocation6]   ;;  %s2631_s22 = scalar_lea.hbm %s3224_s1, 6144 }
   0x3   :  { %s30_s19 = sshll.u32 %s2725_s18, 4  ;;  %p2632_p0 = scmp.ne.s32.totalorder %s3224_s1, %s2631_s22  ;;  %s31_s19 = int_to_ptr.vmem [resolvable:$true] %s30_s19 }
   0x4   :  { %p2635_p1 = scmp.lt.u32.totalorder %s2631_s22, %s3224_s1 }
   0x6   :  { %p2637_p2 = pnand %p2635_p1, %p2632_p0 }
   0x8   :  { %2640 = shalt.err (!%p2637_p2)
}
   0x9   :  { %s2641_s27 = scalar_lea.vmem %s31_s19, 6144  ;;  %p2646_p4 = scmp.lt.s32.totalorder %s31_s19, %s31_s19 }
   0xa   :  { %p2642_p3 = scmp.ne.s32.totalorder %s31_s19, %s2641_s27  ;;  %p2647_p5 = scmp.lt.s32.totalorder %s2641_s27, %s2641_s27 }
   0xc   :  { %p2648_p6 = por %p2647_p5, %p2646_p4 }
   0xe   :  { %p2649_p7 = pnand %p2648_p6, %p2642_p3 }
  0x10   :  { %2652 = shalt.err (!%p2649_p7)
}
  0x11   :  { %s2726_s28 = smov 384   ;;  %s2727_s29 = smov 24  }
  0x12   :  { %36 = dma.hbm_to_vmem [thread:$0]  %s3224_s1, 6144, %s31_s19, [#allocation7], %s2726_s28, %s2726_s28, %s2727_s29  }
  0x13   :  { %s2728_s7 = smov [#allocation3]   ;;  %s2653_s11 = scalar_lea.hbm %s3223_s0, 1536 }
  0x14   :  { %s18_s8 = sshll.u32 %s2728_s7, 4  ;;  %p2654_p8 = scmp.ne.s32.totalorder %s3223_s0, %s2653_s11  ;;  %s19_s8 = int_to_ptr.vmem [resolvable:$true] %s18_s8 }
  0x15   :  { %p2657_p9 = scmp.lt.u32.totalorder %s2653_s11, %s3223_s0 }
  0x17   :  { %p2659_p10 = pnand %p2657_p9, %p2654_p8 }
  0x19   :  { %2662 = shalt.err (!%p2659_p10)
}
  0x1a   :  { %s2663_s16 = scalar_lea.vmem %s19_s8, 1536  ;;  %p2668_p12 = scmp.lt.s32.totalorder %s19_s8, %s19_s8 }
  0x1b   :  { %p2664_p11 = scmp.ne.s32.totalorder %s19_s8, %s2663_s16  ;;  %p2669_p13 = scmp.lt.s32.totalorder %s2663_s16, %s2663_s16 }
  0x1d   :  { %p2670_p0 = por %p2669_p13, %p2668_p12 }
  0x1f   :  { %p2671_p1 = pnand %p2670_p0, %p2664_p11 }
  0x21   :  { %2674 = shalt.err (!%p2671_p1)
}
  0x22   :  { %s2729_s1 = smov 192   ;;  %s2730_s17 = smov 12  }
  0x23   :  { %24 = dma.hbm_to_vmem [thread:$0]  %s3223_s0, 1536, %s19_s8, [#allocation4], %s2729_s1, %s2729_s1, %s2730_s17  }
  0x24   :  { %s2731_s20 = smov [#allocation8]   ;;  %s2675_s24 = scalar_lea.hbm %s3226_s3, 2048 }
  0x25   :  { %s44_s21 = sshll.u32 %s2731_s20, 4  ;;  %p2676_p2 = scmp.ne.s32.totalorder %s3226_s3, %s2675_s24  ;;  %s45_s21 = int_to_ptr.vmem [resolvable:$true] %s44_s21 }
  0x26   :  { %p2679_p3 = scmp.lt.u32.totalorder %s2675_s24, %s3226_s3 }
  0x28   :  { %p2681_p4 = pnand %p2679_p3, %p2676_p2 }
  0x2a   :  { %2684 = shalt.err (!%p2681_p4)
}
  0x2b   :  { %s2685_s29 = scalar_lea.vmem %s45_s21, 2048  ;;  %p2690_p6 = scmp.lt.s32.totalorder %s45_s21, %s45_s21 }
  0x2c   :  { %p2686_p5 = scmp.ne.s32.totalorder %s45_s21, %s2685_s29  ;;  %p2691_p7 = scmp.lt.s32.totalorder %s2685_s29, %s2685_s29 }
  0x2e   :  { %p2692_p8 = por %p2691_p7, %p2690_p6 }
  0x30   :  { %p2693_p9 = pnand %p2692_p8, %p2686_p5 }
  0x32   :  { %2696 = shalt.err (!%p2693_p9)
}
  0x33   :  { %s2732_s0 = smov 128   ;;  %s2733_s30 = smov 8  }
  0x34   :  { %50 = dma.hbm_to_vmem [thread:$0]  %s3226_s3, 2048, %s45_s21, [#allocation7], %s2732_s0, %s2732_s0, %s2733_s30  }
  0x35   :  { %2719 = dma.done.wait [#allocation4], 1536  }
  0x36   :  { %2720 = vsyncadd [#allocation4], 4294965760 }
  0x37   :  { %2721 = dma.done.wait [#allocation7], 8192  }
  0x38   :  { %2722 = vsyncadd [#allocation7], 4294959104  ;;  %v2734_v0 = vmov 0.0|0.0   ;;  %v2735_v1 = vmov 0.0   ;;  %vm2736_vm0 = vmmov 0   ;;  %v68_v2 = vld [vmem:[#allocation6 + $0x8] sm:$0xff] }
  0x39   :  { %2098 = vmatprep.subr.bf16.mxu1 %v2734_v0  ;;  %192 = vmatprep.mubr.f32.mxu0 %v2735_v1  ;;  %v71_v3 = vld [vmem:[#allocation6 + $0x20] sm:$0xff]  ;;  %v70_v6 = vld [vmem:[#allocation6 + $0x18] sm:$0xff]  ;;  %v77_v8 = vld [vmem:[#allocation6 + $0x50] sm:$0xff]  ;;  %s2737_s10 = smov [#allocation9]  }
  0x3a   :  { %1783 = vmatprep.mubr.msk.f32.mxu1 %vm2736_vm0, %v2735_v1  ;;  %v67_v4 = vld [vmem:[#allocation6] sm:$0xff]  ;;  %v2808_v5 = vpack.c.bf16 %v71_v3, %v68_v2  ;;  %v74_v7 = vld [vmem:[#allocation6 + $0x38] sm:$0xff]  ;;  %v73_v11 = vld [vmem:[#allocation6 + $0x30] sm:$0xff]  ;;  %s1570_s11 = sshll.u32 %s2737_s10, 4  ;;  %s1571_s11 = int_to_ptr.vmem [resolvable:$true] %s1570_s11 }
  0x3b   :  { %v2810_v9 = vpack.c.bf16 %v70_v6, %v67_v4  ;;  %v2812_v10 = vpack.c.bf16 %v77_v8, %v74_v7  ;;  %v76_v12 = vld [vmem:[#allocation6 + $0x48] sm:$0xff]  ;;  %v83_v14 = vld [vmem:[#allocation6 + $0x80] sm:$0xff]  ;;  %v82_v18 = vld [vmem:[#allocation6 + $0x78] sm:$0xff]  ;;  %s2697_s12 = scalar_lea.vmem %s1571_s11, 128  ;;  %p2702_p11 = scmp.lt.s32.totalorder %s1571_s11, %s1571_s11 }
  0x3c   :  { %v80_v13 = vld [vmem:[#allocation6 + $0x68] sm:$0xff]  ;;  %2067 = vmatprep.subr.bf16.mxu0 %v2808_v5  ;;  %v2816_v15 = vpack.c.bf16 %v76_v12, %v73_v11  ;;  %v79_v17 = vld [vmem:[#allocation6 + $0x60] sm:$0xff]  ;;  %v86_v19 = vld [vmem:[#allocation6 + $0x98] sm:$0xff]  ;;  %p2698_p10 = scmp.ne.s32.totalorder %s1571_s11, %s2697_s12  ;;  %p2703_p12 = scmp.lt.s32.totalorder %s2697_s12, %s2697_s12 }
  0x3d   :  { %2069 = vmatpush1.bf16.msra.mxu0 %v2810_v9  ;;  %v2819_v16 = vpack.c.bf16 %v83_v14, %v80_v13  ;;  %v89_v20 = vld [vmem:[#allocation6 + $0xb0] sm:$0xff]  ;;  %v2822_v21 = vpack.c.bf16 %v82_v18, %v79_v17  ;;  %v88_v24 = vld [vmem:[#allocation6 + $0xa8] sm:$0xff]  ;;  %v95_v28 = vld [vmem:[#allocation6 + $0xe0] sm:$0xff] }
  0x3e   :  { %2071 = vmatprep.subr.bf16.mxu0 %v2812_v10  ;;  %v85_v22 = vld [vmem:[#allocation6 + $0x90] sm:$0xff]  ;;  %v2825_v23 = vpack.c.bf16 %v89_v20, %v86_v19  ;;  %v72_v26 = vld [vmem:[#allocation6 + $0x28] sm:$0xff]  ;;  %v75_v30 = vld [vmem:[#allocation6 + $0x40] sm:$0xff]  ;;  %p2704_p13 = por %p2703_p12, %p2702_p11 }
  0x3f   :  { %v69_v25 = vld [vmem:[#allocation6 + $0x10] sm:$0xff]  ;;  %v92_v27 = vld [vmem:[#allocation6 + $0xc8] sm:$0xff]  ;;  %v78_v31 = vld [vmem:[#allocation6 + $0x58] sm:$0xff]  ;;  %v2830_v32 = vpack.c.bf16 %v88_v24, %v85_v22 }
  0x40   :  { %v2827_v29 = vpack.c.bf16 %v72_v26, %v69_v25  ;;  %v91_v33 = vld [vmem:[#allocation6 + $0xc0] sm:$0xff]  ;;  %v2833_v34 = vpack.c.bf16 %v78_v31, %v75_v30  ;;  %v2836_v35 = vpack.c.bf16 %v95_v28, %v92_v27  ;;  %v94_v36 = vld [vmem:[#allocation6 + $0xd8] sm:$0xff]  ;;  %v81_v37 = vld [vmem:[#allocation6 + $0x70] sm:$0xff]  ;;  %p2705_p0 = pnand %p2704_p13, %p2698_p10 }
  0x41   :  { %2073 = vmatpush1.bf16.msra.mxu0 %v2816_v15  ;;  %v84_v38 = vld [vmem:[#allocation6 + $0x88] sm:$0xff]  ;;  %v98_v39 = vld [vmem:[#allocation6 + $0xf8] sm:$0xff]  ;;  %v101_v40 = vld [vmem:[#allocation6 + $0x110] sm:$0xff]  ;;  %v2840_v41 = vpack.c.bf16 %v94_v36, %v91_v33 }
  0x42   :  { %2075 = vmatprep.subr.bf16.mxu0 %v2819_v16  ;;  %2100 = vmatpush3.bf16.msra.mxu1 %v2827_v29  ;;  %v97_v42 = vld [vmem:[#allocation6 + $0xf0] sm:$0xff]  ;;  %v2843_v43 = vpack.c.bf16 %v84_v38, %v81_v37  ;;  %v2846_v44 = vpack.c.bf16 %v101_v40, %v98_v39  ;;  %v100_v45 = vld [vmem:[#allocation6 + $0x108] sm:$0xff]  ;;  %v87_v46 = vld [vmem:[#allocation6 + $0xa0] sm:$0xff] }
  0x43   :  { %2101 = vmatprep.subr.bf16.mxu1 %v2734_v0  ;;  %v90_v47 = vld [vmem:[#allocation6 + $0xb8] sm:$0xff]  ;;  %v104_v48 = vld [vmem:[#allocation6 + $0x128] sm:$0xff]  ;;  %v107_v49 = vld [vmem:[#allocation6 + $0x140] sm:$0xff]  ;;  %v2850_v50 = vpack.c.bf16 %v100_v45, %v97_v42 }
  0x44   :  { %v103_v51 = vld [vmem:[#allocation6 + $0x120] sm:$0xff]  ;;  %v2853_v52 = vpack.c.bf16 %v90_v47, %v87_v46  ;;  %v2856_v53 = vpack.c.bf16 %v107_v49, %v104_v48  ;;  %v106_v54 = vld [vmem:[#allocation6 + $0x138] sm:$0xff]  ;;  %v93_v55 = vld [vmem:[#allocation6 + $0xd0] sm:$0xff] }
  0x45   :  { %2077 = vmatpush1.bf16.msra.mxu0 %v2822_v21  ;;  %v96_v56 = vld [vmem:[#allocation6 + $0xe8] sm:$0xff]  ;;  %v110_v57 = vld [vmem:[#allocation6 + $0x158] sm:$0xff]  ;;  %v113_v58 = vld [vmem:[#allocation6 + $0x170] sm:$0xff]  ;;  %v2860_v59 = vpack.c.bf16 %v106_v54, %v103_v51 }
  0x46   :  { %2079 = vmatprep.subr.bf16.mxu0 %v2825_v23  ;;  %2103 = vmatpush3.bf16.msra.mxu1 %v2833_v34  ;;  %v109_v60 = vld [vmem:[#allocation6 + $0x150] sm:$0xff]  ;;  %v2863_v61 = vpack.c.bf16 %v96_v56, %v93_v55  ;;  %v2866_v62 = vpack.c.bf16 %v113_v58, %v110_v57  ;;  %v112_v63 = vld [vmem:[#allocation6 + $0x168] sm:$0xff]  ;;  %v99_v2 = vld [vmem:[#allocation6 + $0x100] sm:$0xff] }
  0x47   :  { %2104 = vmatprep.subr.bf16.mxu1 %v2734_v0  ;;  %v102_v3 = vld [vmem:[#allocation6 + $0x118] sm:$0xff]  ;;  %v2870_v4 = vpack.c.bf16 %v112_v63, %v109_v60  ;;  %v105_v7 = vld [vmem:[#allocation6 + $0x130] sm:$0xff]  ;;  %v108_v8 = vld [vmem:[#allocation6 + $0x148] sm:$0xff] }
  0x48   :  { %v2873_v6 = vpack.c.bf16 %v102_v3, %v99_v2  ;;  %v2879_v11 = vpack.c.bf16 %v108_v8, %v105_v7  ;;  %v111_v12 = vld [vmem:[#allocation6 + $0x160] sm:$0xff]  ;;  %v114_v13 = vld [vmem:[#allocation6 + $0x178] sm:$0xff]  ;;  %v2931_v37 = vld [vmem:[#allocation3 + $0x8] ss:$12 sps:$4 sm:$0xff]  }
  0x49   :  { %2081 = vmatpush1.bf16.msra.mxu0 %v2830_v32  ;;  %v2885_v14 = vpack.c.bf16 %v114_v13, %v111_v12  ;;  %v123_v17 = vld [vmem:[#allocation3] sm:$0xff]  ;;  %v127_v40 = vunpack.c.l.bf16 %v2931_v37  ;;  %v291_v56 = vld [vmem:[#allocation3 + $0xc] sm:$0xff] }
  0x4a   :  { %2083 = vmatprep.subr.bf16.mxu0 %v2836_v35  ;;  %2106 = vmatpush3.bf16.msra.mxu1 %v2843_v43  ;;  %v125_v18 = vunpack.c.l.bf16 %v123_v17  ;;  %v126_v25 = vunpack.c.h.bf16 %v123_v17  ;;  %v2929_v36 = vld [vmem:[%s3225_s2] ss:$0 sm:$0xff]  ;;  %v293_v57 = vunpack.c.l.bf16 %v291_v56  ;;  %v294_v8 = vunpack.c.h.bf16 %v291_v56 }
  0x4b   :  { %2107 = vmatprep.subr.bf16.mxu1 %v2734_v0 }
  0x4d   :  { %2085 = vmatpush1.bf16.msra.mxu0 %v2840_v41 }
  0x4e   :  { %2087 = vmatprep.subr.bf16.mxu0 %v2846_v44  ;;  %2109 = vmatpush3.bf16.msra.mxu1 %v2853_v52 }
  0x4f   :  { %2110 = vmatprep.subr.bf16.mxu1 %v2734_v0 }
  0x51   :  { %2089 = vmatpush1.bf16.msra.mxu0 %v2850_v50 }
  0x52   :  { %2091 = vmatprep.subr.bf16.mxu0 %v2856_v53  ;;  %2112 = vmatpush3.bf16.msra.mxu1 %v2863_v61 }
  0x53   :  { %2113 = vmatprep.subr.bf16.mxu1 %v2734_v0 }
  0x55   :  { %2093 = vmatpush1.bf16.msra.mxu0 %v2860_v59 }
  0x56   :  { %2095 = vmatprep.subr.bf16.mxu0 %v2866_v62  ;;  %2115 = vmatpush3.bf16.msra.mxu1 %v2873_v6 }
  0x57   :  { %2116 = vmatprep.subr.bf16.mxu1 %v2734_v0 }
  0x59   :  { %2097 = vmatpush1.bf16.msra.mxu0 %v2870_v4 }
  0x5a   :  { %2123 = vmatprep.subr.bf16.mxu0 %v2808_v5  ;;  %2118 = vmatpush3.bf16.msra.mxu1 %v2879_v11 }
  0x5b   :  { %2119 = vmatprep.subr.bf16.mxu1 %v2734_v0 }
  0x5c   :  { %193 = vmatmul.mubr.f32.vlgmr.msra.gmra.mrb[0].mxu0 %v2735_v1 }
  0x5d   :  { %2125 = vmatpush1.bf16.msra.mxu0 %v2810_v9  ;;  %360 = vmatprep.mubr.f32.mxu0 %v2735_v1 }
  0x5e   :  { %2127 = vmatprep.subr.bf16.mxu0 %v2812_v10  ;;  %2121 = vmatpush3.bf16.msra.mxu1 %v2885_v14 }
  0x5f   :  { %2154 = vmatprep.subr.bf16.mxu1 %v2734_v0 }
  0x61   :  { %2129 = vmatpush1.bf16.msra.mxu0 %v2816_v15  ;;  %1784 = vmatmul.mubr.f32.vlgmr.msra.gmra.mrb[0].mxu1 %v2735_v1 }
  0x62   :  { %2131 = vmatprep.subr.bf16.mxu0 %v2819_v16  ;;  %2156 = vmatpush3.bf16.msra.mxu1 %v2827_v29 }
  0x63   :  { %2157 = vmatprep.subr.bf16.mxu1 %v2734_v0  ;;  %1818 = vmatprep.mubr.msk.f32.mxu1 %vm2736_vm0, %v2735_v1 }
  0x65   :  { %2133 = vmatpush1.bf16.msra.mxu0 %v2822_v21 }
  0x66   :  { %2135 = vmatprep.subr.bf16.mxu0 %v2825_v23  ;;  %2159 = vmatpush3.bf16.msra.mxu1 %v2833_v34 }
  0x67   :  { %2160 = vmatprep.subr.bf16.mxu1 %v2734_v0 }
  0x69   :  { %2137 = vmatpush1.bf16.msra.mxu0 %v2830_v32 }
  0x6a   :  { %2139 = vmatprep.subr.bf16.mxu0 %v2836_v35  ;;  %2162 = vmatpush3.bf16.msra.mxu1 %v2843_v43 }
  0x6b   :  { %2163 = vmatprep.subr.bf16.mxu1 %v2734_v0 }
  0x6d   :  { %2141 = vmatpush1.bf16.msra.mxu0 %v2840_v41 }
  0x6e   :  { %2143 = vmatprep.subr.bf16.mxu0 %v2846_v44  ;;  %2165 = vmatpush3.bf16.msra.mxu1 %v2853_v52 }
  0x6f   :  { %2166 = vmatprep.subr.bf16.mxu1 %v2734_v0 }
  0x71   :  { %2145 = vmatpush1.bf16.msra.mxu0 %v2850_v50 }
  0x72   :  { %2147 = vmatprep.subr.bf16.mxu0 %v2856_v53  ;;  %2168 = vmatpush3.bf16.msra.mxu1 %v2863_v61 }
  0x73   :  { %2169 = vmatprep.subr.bf16.mxu1 %v2734_v0 }
  0x75   :  { %2149 = vmatpush1.bf16.msra.mxu0 %v2860_v59 }
  0x76   :  { %2151 = vmatprep.subr.bf16.mxu0 %v2866_v62  ;;  %2171 = vmatpush3.bf16.msra.mxu1 %v2873_v6 }
  0x77   :  { %2172 = vmatprep.subr.bf16.mxu1 %v2734_v0 }
  0x79   :  { %2153 = vmatpush1.bf16.msra.mxu0 %v2870_v4 }
  0x7a   :  { %2179 = vmatprep.subr.bf16.mxu0 %v2808_v5  ;;  %2174 = vmatpush3.bf16.msra.mxu1 %v2879_v11 }
  0x7b   :  { %2175 = vmatprep.subr.bf16.mxu1 %v2734_v0 }
  0x7e   :  { %2177 = vmatpush3.bf16.msra.mxu1 %v2885_v14 }
  0x7f   :  { %2210 = vmatprep.subr.bf16.mxu1 %v2734_v0 }
 0x12f   :  { %v194_v19 = vpop.f32.mrb[0].mxu0 }
 0x130   :  { %v269_v20 = vadd.f32 %v194_v19, %v125_v18  ;;  %v196_v22 = vpop.f32.mrb[1].mxu0 }
 0x131   :  { %v276_v27 = vadd.f32 %v196_v22, %v126_v25 }
 0x132   :  { %v1581_v24 = vmul.f32 -1.442695, %v269_v20  ;;  %v295_v20 = vunpack.c.h.bf16 %v2931_v37  ;;  %v459_v37 = vld [vmem:[#allocation3 + $0x18] sm:$0xff] }
 0x133   :  { %v1582_v30 = vmul.f32 -1.442695, %v276_v27 }
 0x134   :  { %2551 = vpow2.f32 %v1581_v24  ;;  %v265_v26 = vpop.f32.mrb[0].mxu1 }
 0x135   :  { %v1785_v28 = vpop.f32.mrb[1].mxu1  ;;  %2553 = vpow2.f32 %v1582_v30  ;;  %v283_v38 = vadd.f32 %v2929_v36, %v265_v26 }
 0x13e   :  { %v2552_v31 = vpop.eup %2551 }
 0x13f   :  { %v273_v33 = vadd.f32 1.0, %v2552_v31  ;;  %v2554_v39 = vpop.eup %2553 }
 0x140   :  { %v280_v46 = vadd.f32 1.0, %v2554_v39  ;;  %v461_v39 = vunpack.c.l.bf16 %v459_v37 }
 0x141   :  { %2555 = vrcp.f32 %v273_v33 }
 0x14b   :  { %v2556_v42 = vpop.eup %2555 }
 0x14c   :  { %v284_v45 = vmul.f32 %v2556_v42, %v283_v38 }
 0x14e   :  { %v285_v47 = vadd.f32 %v284_v45, %v127_v40 }
 0x150   :  { %2557 = vtanh.f32 %v285_v47 }
 0x151   :  { %2559 = vrcp.f32 %v280_v46 }
 0x15a   :  { %v2558_v48 = vpop.eup %2557 }
 0x15b   :  { %v287_v49 = vsub.f32 0.0, %v2558_v48  ;;  %v2560_v51 = vpop.eup %2559 }
 0x15d   :  { %v288_v54 = vmul.f32 %v2560_v51, %v287_v49  ;;  %v462_v49 = vunpack.c.h.bf16 %v459_v37 }
 0x15f   :  { %v2935_v55 = vadd.f32 %v2558_v48, %v288_v54 }
 0x161   :  { %361 = vmatmul.mubr.f32.vlgmr.msra.gmra.mrb[2].mxu0 %v2935_v55  ;;  %1819 = vmatmul.mubr.f32.vlgmr.msra.gmra.mrb[2].mxu1 %v2935_v55 }
 0x162   :  { %2181 = vmatpush1.bf16.msra.mxu0 %v2810_v9  ;;  %2212 = vmatpush3.bf16.msra.mxu1 %v2827_v29 }
 0x163   :  { %2183 = vmatprep.subr.bf16.mxu0 %v2812_v10  ;;  %2213 = vmatprep.subr.bf16.mxu1 %v2734_v0 }
 0x164   :  { %528 = vmatprep.mubr.f32.mxu0 %v2735_v1  ;;  %1853 = vmatprep.mubr.msk.f32.mxu1 %vm2736_vm0, %v2735_v1 }
 0x166   :  { %2185 = vmatpush1.bf16.msra.mxu0 %v2816_v15  ;;  %2215 = vmatpush3.bf16.msra.mxu1 %v2833_v34 }
 0x167   :  { %2187 = vmatprep.subr.bf16.mxu0 %v2819_v16  ;;  %2216 = vmatprep.subr.bf16.mxu1 %v2734_v0 }
 0x16a   :  { %2189 = vmatpush1.bf16.msra.mxu0 %v2822_v21  ;;  %2218 = vmatpush3.bf16.msra.mxu1 %v2843_v43 }
 0x16b   :  { %2191 = vmatprep.subr.bf16.mxu0 %v2825_v23  ;;  %2219 = vmatprep.subr.bf16.mxu1 %v2734_v0 }
 0x16e   :  { %2193 = vmatpush1.bf16.msra.mxu0 %v2830_v32  ;;  %2221 = vmatpush3.bf16.msra.mxu1 %v2853_v52 }
 0x16f   :  { %2195 = vmatprep.subr.bf16.mxu0 %v2836_v35  ;;  %2222 = vmatprep.subr.bf16.mxu1 %v2734_v0 }
 0x172   :  { %2197 = vmatpush1.bf16.msra.mxu0 %v2840_v41  ;;  %2224 = vmatpush3.bf16.msra.mxu1 %v2863_v61 }
 0x173   :  { %2199 = vmatprep.subr.bf16.mxu0 %v2846_v44  ;;  %2225 = vmatprep.subr.bf16.mxu1 %v2734_v0 }
 0x176   :  { %2201 = vmatpush1.bf16.msra.mxu0 %v2850_v50  ;;  %2227 = vmatpush3.bf16.msra.mxu1 %v2873_v6 }
 0x177   :  { %2203 = vmatprep.subr.bf16.mxu0 %v2856_v53  ;;  %2228 = vmatprep.subr.bf16.mxu1 %v2734_v0 }
 0x17a   :  { %2205 = vmatpush1.bf16.msra.mxu0 %v2860_v59  ;;  %2230 = vmatpush3.bf16.msra.mxu1 %v2879_v11 }
 0x17b   :  { %2207 = vmatprep.subr.bf16.mxu0 %v2866_v62  ;;  %2231 = vmatprep.subr.bf16.mxu1 %v2734_v0 }
 0x17e   :  { %2209 = vmatpush1.bf16.msra.mxu0 %v2870_v4  ;;  %2233 = vmatpush3.bf16.msra.mxu1 %v2885_v14 }
 0x17f   :  { %2235 = vmatprep.subr.bf16.mxu0 %v2808_v5  ;;  %2266 = vmatprep.subr.bf16.mxu1 %v2734_v0 }
 0x234   :  { %v362_v58 = vpop.f32.mrb[2].mxu0  ;;  %v433_v60 = vpop.f32.mrb[2].mxu1 }
 0x235   :  { %v437_v63 = vadd.f32 %v362_v58, %v293_v57  ;;  %v364_v2 = vpop.f32.mrb[3].mxu0  ;;  %v1820_v3 = vpop.f32.mrb[3].mxu1  ;;  %v451_v22 = vadd.f32 %v2929_v36, %v433_v60  ;;  %v3016_v57 = vld [vmem:[#allocation3 + $0x20] ss:$12 sps:$4 sm:$0xff]  }
 0x236   :  { %v444_v12 = vadd.f32 %v364_v2, %v294_v8  ;;  %v463_v60 = vunpack.c.l.bf16 %v3016_v57 }
 0x237   :  { %v1583_v7 = vmul.f32 -1.442695, %v437_v63 }
 0x238   :  { %v1584_v13 = vmul.f32 -1.442695, %v444_v12 }
 0x239   :  { %2561 = vpow2.f32 %v1583_v7 }
 0x23a   :  { %2563 = vpow2.f32 %v1584_v13 }
 0x243   :  { %v2562_v17 = vpop.eup %2561 }
 0x244   :  { %v441_v18 = vadd.f32 1.0, %v2562_v17  ;;  %v2564_v19 = vpop.eup %2563 }
 0x245   :  { %v448_v27 = vadd.f32 1.0, %v2564_v19 }
 0x246   :  { %2565 = vrcp.f32 %v441_v18 }
 0x250   :  { %v2566_v24 = vpop.eup %2565 }
 0x251   :  { %v452_v25 = vmul.f32 %v2566_v24, %v451_v22 }
 0x253   :  { %v453_v26 = vadd.f32 %v452_v25, %v295_v20  ;;  %v627_v20 = vld [vmem:[#allocation3 + $0x24] sm:$0xff] }
 0x254   :  { %v629_v22 = vunpack.c.l.bf16 %v627_v20 }
 0x255   :  { %2567 = vtanh.f32 %v453_v26 }
 0x256   :  { %2569 = vrcp.f32 %v448_v27 }
 0x25f   :  { %v2568_v28 = vpop.eup %2567 }
 0x260   :  { %v455_v30 = vsub.f32 %v2935_v55, %v2568_v28  ;;  %v2570_v31 = vpop.eup %2569 }
 0x262   :  { %v456_v33 = vmul.f32 %v2570_v31, %v455_v30  ;;  %v630_v31 = vunpack.c.h.bf16 %v627_v20 }
 0x264   :  { %v2977_v38 = vadd.f32 %v2568_v28, %v456_v33 }
 0x266   :  { %529 = vmatmul.mubr.f32.vlgmr.msra.gmra.mrb[4].mxu0 %v2977_v38  ;;  %1854 = vmatmul.mubr.f32.vlgmr.msra.gmra.mrb[4].mxu1 %v2977_v38 }
 0x267   :  { %2237 = vmatpush1.bf16.msra.mxu0 %v2810_v9  ;;  %2268 = vmatpush3.bf16.msra.mxu1 %v2827_v29 }
 0x268   :  { %2239 = vmatprep.subr.bf16.mxu0 %v2812_v10  ;;  %2269 = vmatprep.subr.bf16.mxu1 %v2734_v0 }
 0x269   :  { %696 = vmatprep.mubr.f32.mxu0 %v2735_v1  ;;  %1888 = vmatprep.mubr.msk.f32.mxu1 %vm2736_vm0, %v2735_v1 }
 0x26b   :  { %2241 = vmatpush1.bf16.msra.mxu0 %v2816_v15  ;;  %2271 = vmatpush3.bf16.msra.mxu1 %v2833_v34 }
 0x26c   :  { %2243 = vmatprep.subr.bf16.mxu0 %v2819_v16  ;;  %2272 = vmatprep.subr.bf16.mxu1 %v2734_v0 }
 0x26f   :  { %2245 = vmatpush1.bf16.msra.mxu0 %v2822_v21  ;;  %2274 = vmatpush3.bf16.msra.mxu1 %v2843_v43 }
 0x270   :  { %2247 = vmatprep.subr.bf16.mxu0 %v2825_v23  ;;  %2275 = vmatprep.subr.bf16.mxu1 %v2734_v0 }
 0x273   :  { %2249 = vmatpush1.bf16.msra.mxu0 %v2830_v32  ;;  %2277 = vmatpush3.bf16.msra.mxu1 %v2853_v52 }
 0x274   :  { %2251 = vmatprep.subr.bf16.mxu0 %v2836_v35  ;;  %2278 = vmatprep.subr.bf16.mxu1 %v2734_v0 }
 0x277   :  { %2253 = vmatpush1.bf16.msra.mxu0 %v2840_v41  ;;  %2280 = vmatpush3.bf16.msra.mxu1 %v2863_v61 }
 0x278   :  { %2255 = vmatprep.subr.bf16.mxu0 %v2846_v44  ;;  %2281 = vmatprep.subr.bf16.mxu1 %v2734_v0 }
 0x27b   :  { %2257 = vmatpush1.bf16.msra.mxu0 %v2850_v50  ;;  %2283 = vmatpush3.bf16.msra.mxu1 %v2873_v6 }
 0x27c   :  { %2259 = vmatprep.subr.bf16.mxu0 %v2856_v53  ;;  %2284 = vmatprep.subr.bf16.mxu1 %v2734_v0 }
 0x27f   :  { %2261 = vmatpush1.bf16.msra.mxu0 %v2860_v59  ;;  %2286 = vmatpush3.bf16.msra.mxu1 %v2879_v11 }
 0x280   :  { %2263 = vmatprep.subr.bf16.mxu0 %v2866_v62  ;;  %2287 = vmatprep.subr.bf16.mxu1 %v2734_v0 }
 0x283   :  { %2265 = vmatpush1.bf16.msra.mxu0 %v2870_v4  ;;  %2289 = vmatpush3.bf16.msra.mxu1 %v2885_v14 }
 0x284   :  { %2291 = vmatprep.subr.bf16.mxu0 %v2808_v5  ;;  %2322 = vmatprep.subr.bf16.mxu1 %v2734_v0 }
 0x339   :  { %v530_v40 = vpop.f32.mrb[4].mxu0  ;;  %v601_v42 = vpop.f32.mrb[4].mxu1 }
 0x33a   :  { %v605_v45 = vadd.f32 %v530_v40, %v461_v39  ;;  %v532_v46 = vpop.f32.mrb[5].mxu0  ;;  %v1855_v47 = vpop.f32.mrb[5].mxu1  ;;  %v619_v63 = vadd.f32 %v2929_v36, %v601_v42  ;;  %v631_v42 = vunpack.c.h.bf16 %v3016_v57  ;;  %v795_v57 = vld [vmem:[#allocation3 + $0x30] sm:$0xff] }
 0x33b   :  { %v612_v51 = vadd.f32 %v532_v46, %v462_v49 }
 0x33c   :  { %v1585_v48 = vmul.f32 -1.442695, %v605_v45 }
 0x33d   :  { %v1586_v54 = vmul.f32 -1.442695, %v612_v51 }
 0x33e   :  { %2571 = vpow2.f32 %v1585_v48 }
 0x33f   :  { %2573 = vpow2.f32 %v1586_v54 }
 0x348   :  { %v2572_v55 = vpop.eup %2571 }
 0x349   :  { %v609_v56 = vadd.f32 1.0, %v2572_v55  ;;  %v2574_v58 = vpop.eup %2573 }
 0x34a   :  { %v616_v8 = vadd.f32 1.0, %v2574_v58 }
 0x34b   :  { %2575 = vrcp.f32 %v609_v56 }
 0x355   :  { %v2576_v2 = vpop.eup %2575 }
 0x356   :  { %v620_v3 = vmul.f32 %v2576_v2, %v619_v63 }
 0x358   :  { %v621_v7 = vadd.f32 %v620_v3, %v463_v60  ;;  %v797_v60 = vunpack.c.l.bf16 %v795_v57 }
 0x35a   :  { %2577 = vtanh.f32 %v621_v7 }
 0x35b   :  { %2579 = vrcp.f32 %v616_v8 }
 0x364   :  { %v2578_v12 = vpop.eup %2577 }
 0x365   :  { %v623_v13 = vsub.f32 %v2977_v38, %v2578_v12  ;;  %v2580_v17 = vpop.eup %2579 }
 0x367   :  { %v624_v18 = vmul.f32 %v2580_v17, %v623_v13  ;;  %v798_v13 = vunpack.c.h.bf16 %v795_v57 }
 0x369   :  { %v3021_v19 = vadd.f32 %v2578_v12, %v624_v18 }
 0x36b   :  { %697 = vmatmul.mubr.f32.vlgmr.msra.gmra.mrb[6].mxu0 %v3021_v19  ;;  %1889 = vmatmul.mubr.f32.vlgmr.msra.gmra.mrb[6].mxu1 %v3021_v19 }
 0x36c   :  { %2293 = vmatpush1.bf16.msra.mxu0 %v2810_v9  ;;  %2324 = vmatpush3.bf16.msra.mxu1 %v2827_v29 }
 0x36d   :  { %2295 = vmatprep.subr.bf16.mxu0 %v2812_v10  ;;  %2325 = vmatprep.subr.bf16.mxu1 %v2734_v0 }
 0x36e   :  { %864 = vmatprep.mubr.f32.mxu0 %v2735_v1  ;;  %1923 = vmatprep.mubr.msk.f32.mxu1 %vm2736_vm0, %v2735_v1 }
 0x370   :  { %2297 = vmatpush1.bf16.msra.mxu0 %v2816_v15  ;;  %2327 = vmatpush3.bf16.msra.mxu1 %v2833_v34 }
 0x371   :  { %2299 = vmatprep.subr.bf16.mxu0 %v2819_v16  ;;  %2328 = vmatprep.subr.bf16.mxu1 %v2734_v0 }
 0x374   :  { %2301 = vmatpush1.bf16.msra.mxu0 %v2822_v21  ;;  %2330 = vmatpush3.bf16.msra.mxu1 %v2843_v43 }
 0x375   :  { %2303 = vmatprep.subr.bf16.mxu0 %v2825_v23  ;;  %2331 = vmatprep.subr.bf16.mxu1 %v2734_v0 }
 0x378   :  { %2305 = vmatpush1.bf16.msra.mxu0 %v2830_v32  ;;  %2333 = vmatpush3.bf16.msra.mxu1 %v2853_v52 }
 0x379   :  { %2307 = vmatprep.subr.bf16.mxu0 %v2836_v35  ;;  %2334 = vmatprep.subr.bf16.mxu1 %v2734_v0 }
 0x37c   :  { %2309 = vmatpush1.bf16.msra.mxu0 %v2840_v41  ;;  %2336 = vmatpush3.bf16.msra.mxu1 %v2863_v61 }
 0x37d   :  { %2311 = vmatprep.subr.bf16.mxu0 %v2846_v44  ;;  %2337 = vmatprep.subr.bf16.mxu1 %v2734_v0 }
 0x380   :  { %2313 = vmatpush1.bf16.msra.mxu0 %v2850_v50  ;;  %2339 = vmatpush3.bf16.msra.mxu1 %v2873_v6 }
 0x381   :  { %2315 = vmatprep.subr.bf16.mxu0 %v2856_v53  ;;  %2340 = vmatprep.subr.bf16.mxu1 %v2734_v0 }
 0x384   :  { %2317 = vmatpush1.bf16.msra.mxu0 %v2860_v59  ;;  %2342 = vmatpush3.bf16.msra.mxu1 %v2879_v11 }
 0x385   :  { %2319 = vmatprep.subr.bf16.mxu0 %v2866_v62  ;;  %2343 = vmatprep.subr.bf16.mxu1 %v2734_v0 }
 0x388   :  { %2321 = vmatpush1.bf16.msra.mxu0 %v2870_v4  ;;  %2345 = vmatpush3.bf16.msra.mxu1 %v2885_v14 }
 0x389   :  { %2347 = vmatprep.subr.bf16.mxu0 %v2808_v5  ;;  %2378 = vmatprep.subr.bf16.mxu1 %v2734_v0 }
 0x43e   :  { %v698_v24 = vpop.f32.mrb[6].mxu0  ;;  %v769_v25 = vpop.f32.mrb[6].mxu1 }
 0x43f   :  { %v773_v26 = vadd.f32 %v698_v24, %v629_v22  ;;  %v700_v27 = vpop.f32.mrb[7].mxu0  ;;  %v1890_v28 = vpop.f32.mrb[7].mxu1  ;;  %v787_v45 = vadd.f32 %v2929_v36, %v769_v25  ;;  %v3102_v22 = vld [vmem:[#allocation3 + $0x38] ss:$12 sps:$4 sm:$0xff]  }
 0x440   :  { %v780_v33 = vadd.f32 %v700_v27, %v630_v31  ;;  %v799_v25 = vunpack.c.l.bf16 %v3102_v22 }
 0x441   :  { %v1587_v30 = vmul.f32 -1.442695, %v773_v26 }
 0x442   :  { %v1588_v38 = vmul.f32 -1.442695, %v780_v33 }
 0x443   :  { %2581 = vpow2.f32 %v1587_v30 }
 0x444   :  { %2583 = vpow2.f32 %v1588_v38 }
 0x44d   :  { %v2582_v37 = vpop.eup %2581 }
 0x44e   :  { %v777_v39 = vadd.f32 1.0, %v2582_v37  ;;  %v2584_v40 = vpop.eup %2583 }
 0x44f   :  { %v784_v49 = vadd.f32 1.0, %v2584_v40 }
 0x450   :  { %2585 = vrcp.f32 %v777_v39 }
 0x45a   :  { %v2586_v46 = vpop.eup %2585 }
 0x45b   :  { %v788_v47 = vmul.f32 %v2586_v46, %v787_v45 }
 0x45d   :  { %v789_v48 = vadd.f32 %v788_v47, %v631_v42  ;;  %v963_v42 = vld [vmem:[#allocation3 + $0x3c] sm:$0xff] }
 0x45e   :  { %v965_v45 = vunpack.c.l.bf16 %v963_v42 }
 0x45f   :  { %2587 = vtanh.f32 %v789_v48 }
 0x460   :  { %2589 = vrcp.f32 %v784_v49 }
 0x469   :  { %v2588_v51 = vpop.eup %2587 }
 0x46a   :  { %v791_v54 = vsub.f32 %v3021_v19, %v2588_v51  ;;  %v2590_v55 = vpop.eup %2589 }
 0x46c   :  { %v792_v56 = vmul.f32 %v2590_v55, %v791_v54  ;;  %v966_v55 = vunpack.c.h.bf16 %v963_v42 }
 0x46e   :  { %v3063_v58 = vadd.f32 %v2588_v51, %v792_v56 }
 0x470   :  { %865 = vmatmul.mubr.f32.vlgmr.msra.gmra.mrb[8].mxu0 %v3063_v58  ;;  %1924 = vmatmul.mubr.f32.vlgmr.msra.gmra.mrb[8].mxu1 %v3063_v58 }
 0x471   :  { %2349 = vmatpush1.bf16.msra.mxu0 %v2810_v9  ;;  %2380 = vmatpush3.bf16.msra.mxu1 %v2827_v29 }
 0x472   :  { %2351 = vmatprep.subr.bf16.mxu0 %v2812_v10  ;;  %2381 = vmatprep.subr.bf16.mxu1 %v2734_v0 }
 0x473   :  { %1032 = vmatprep.mubr.f32.mxu0 %v2735_v1  ;;  %1958 = vmatprep.mubr.msk.f32.mxu1 %vm2736_vm0, %v2735_v1 }
 0x475   :  { %2353 = vmatpush1.bf16.msra.mxu0 %v2816_v15  ;;  %2383 = vmatpush3.bf16.msra.mxu1 %v2833_v34 }
 0x476   :  { %2355 = vmatprep.subr.bf16.mxu0 %v2819_v16  ;;  %2384 = vmatprep.subr.bf16.mxu1 %v2734_v0 }
 0x479   :  { %2357 = vmatpush1.bf16.msra.mxu0 %v2822_v21  ;;  %2386 = vmatpush3.bf16.msra.mxu1 %v2843_v43 }
 0x47a   :  { %2359 = vmatprep.subr.bf16.mxu0 %v2825_v23  ;;  %2387 = vmatprep.subr.bf16.mxu1 %v2734_v0 }
 0x47d   :  { %2361 = vmatpush1.bf16.msra.mxu0 %v2830_v32  ;;  %2389 = vmatpush3.bf16.msra.mxu1 %v2853_v52 }
 0x47e   :  { %2363 = vmatprep.subr.bf16.mxu0 %v2836_v35  ;;  %2390 = vmatprep.subr.bf16.mxu1 %v2734_v0 }
 0x481   :  { %2365 = vmatpush1.bf16.msra.mxu0 %v2840_v41  ;;  %2392 = vmatpush3.bf16.msra.mxu1 %v2863_v61 }
 0x482   :  { %2367 = vmatprep.subr.bf16.mxu0 %v2846_v44  ;;  %2393 = vmatprep.subr.bf16.mxu1 %v2734_v0 }
 0x485   :  { %2369 = vmatpush1.bf16.msra.mxu0 %v2850_v50  ;;  %2395 = vmatpush3.bf16.msra.mxu1 %v2873_v6 }
 0x486   :  { %2371 = vmatprep.subr.bf16.mxu0 %v2856_v53  ;;  %2396 = vmatprep.subr.bf16.mxu1 %v2734_v0 }
 0x489   :  { %2373 = vmatpush1.bf16.msra.mxu0 %v2860_v59  ;;  %2398 = vmatpush3.bf16.msra.mxu1 %v2879_v11 }
 0x48a   :  { %2375 = vmatprep.subr.bf16.mxu0 %v2866_v62  ;;  %2399 = vmatprep.subr.bf16.mxu1 %v2734_v0 }
 0x48d   :  { %2377 = vmatpush1.bf16.msra.mxu0 %v2870_v4  ;;  %2401 = vmatpush3.bf16.msra.mxu1 %v2885_v14 }
 0x48e   :  { %2403 = vmatprep.subr.bf16.mxu0 %v2808_v5  ;;  %2434 = vmatprep.subr.bf16.mxu1 %v2734_v0 }
 0x543   :  { %v866_v63 = vpop.f32.mrb[8].mxu0  ;;  %v937_v2 = vpop.f32.mrb[8].mxu1 }
 0x544   :  { %v941_v3 = vadd.f32 %v866_v63, %v797_v60  ;;  %v868_v7 = vpop.f32.mrb[9].mxu0  ;;  %v1925_v8 = vpop.f32.mrb[9].mxu1  ;;  %v955_v26 = vadd.f32 %v2929_v36, %v937_v2 }
 0x545   :  { %v948_v17 = vadd.f32 %v868_v7, %v798_v13 }
 0x546   :  { %v1589_v12 = vmul.f32 -1.442695, %v941_v3 }
 0x547   :  { %v1590_v18 = vmul.f32 -1.442695, %v948_v17 }
 0x548   :  { %2591 = vpow2.f32 %v1589_v12 }
 0x549   :  { %2593 = vpow2.f32 %v1590_v18 }
 0x552   :  { %v2592_v19 = vpop.eup %2591 }
 0x553   :  { %v945_v20 = vadd.f32 1.0, %v2592_v19  ;;  %v2594_v24 = vpop.eup %2593 }
 0x554   :  { %v952_v31 = vadd.f32 1.0, %v2594_v24 }
 0x555   :  { %2595 = vrcp.f32 %v945_v20 }
 0x55f   :  { %v2596_v27 = vpop.eup %2595 }
 0x560   :  { %v956_v28 = vmul.f32 %v2596_v27, %v955_v26  ;;  %v1470_v26 = vld [vmem:[#allocation8] sm:$0xff]  ;;  %v1471_v27 = vld [vmem:[#allocation8 + $0x8] sm:$0xff] }
 0x562   :  { %v957_v30 = vadd.f32 %v956_v28, %v799_v25  ;;  %v2515_v28 = vpack.c.bf16 %v1471_v27, %v1470_v26 }
 0x564   :  { %2597 = vtanh.f32 %v957_v30  ;;  %v1472_v30 = vld [vmem:[#allocation8 + $0x10] sm:$0xff] }
 0x565   :  { %2599 = vrcp.f32 %v952_v31  ;;  %v1473_v31 = vld [vmem:[#allocation8 + $0x18] sm:$0xff] }
 0x56e   :  { %v2598_v33 = vpop.eup %2597 }
 0x56f   :  { %v959_v38 = vsub.f32 %v3063_v58, %v2598_v33  ;;  %v2600_v37 = vpop.eup %2599 }
 0x571   :  { %v960_v39 = vmul.f32 %v2600_v37, %v959_v38  ;;  %v1474_v38 = vld [vmem:[#allocation8 + $0x20] sm:$0xff]  ;;  %v1475_v37 = vld [vmem:[#allocation8 + $0x28] sm:$0xff] }
 0x573   :  { %v3107_v40 = vadd.f32 %v2598_v33, %v960_v39  ;;  %v2518_v33 = vpack.c.bf16 %v1473_v31, %v1472_v30  ;;  %v2521_v39 = vpack.c.bf16 %v1475_v37, %v1474_v38 }
 0x575   :  { %1033 = vmatmul.mubr.f32.vlgmr.msra.gmra.mrb[10].mxu0 %v3107_v40  ;;  %1959 = vmatmul.mubr.f32.vlgmr.msra.gmra.mrb[10].mxu1 %v3107_v40 }
 0x576   :  { %2405 = vmatpush1.bf16.msra.mxu0 %v2810_v9  ;;  %2436 = vmatpush3.bf16.msra.mxu1 %v2827_v29 }
 0x577   :  { %2407 = vmatprep.subr.bf16.mxu0 %v2812_v10  ;;  %2437 = vmatprep.subr.bf16.mxu1 %v2734_v0 }
 0x578   :  { %1200 = vmatprep.mubr.f32.mxu0 %v2735_v1  ;;  %1993 = vmatprep.mubr.msk.f32.mxu1 %vm2736_vm0, %v2735_v1 }
 0x57a   :  { %2409 = vmatpush1.bf16.msra.mxu0 %v2816_v15  ;;  %2439 = vmatpush3.bf16.msra.mxu1 %v2833_v34 }
 0x57b   :  { %2411 = vmatprep.subr.bf16.mxu0 %v2819_v16  ;;  %2440 = vmatprep.subr.bf16.mxu1 %v2734_v0 }
 0x57e   :  { %2413 = vmatpush1.bf16.msra.mxu0 %v2822_v21  ;;  %2442 = vmatpush3.bf16.msra.mxu1 %v2843_v43 }
 0x57f   :  { %2415 = vmatprep.subr.bf16.mxu0 %v2825_v23  ;;  %2443 = vmatprep.subr.bf16.mxu1 %v2734_v0 }
 0x582   :  { %2417 = vmatpush1.bf16.msra.mxu0 %v2830_v32  ;;  %2445 = vmatpush3.bf16.msra.mxu1 %v2853_v52 }
 0x583   :  { %2419 = vmatprep.subr.bf16.mxu0 %v2836_v35  ;;  %2446 = vmatprep.subr.bf16.mxu1 %v2734_v0 }
 0x586   :  { %2421 = vmatpush1.bf16.msra.mxu0 %v2840_v41  ;;  %2448 = vmatpush3.bf16.msra.mxu1 %v2863_v61 }
 0x587   :  { %2423 = vmatprep.subr.bf16.mxu0 %v2846_v44  ;;  %2449 = vmatprep.subr.bf16.mxu1 %v2734_v0 }
 0x58a   :  { %2425 = vmatpush1.bf16.msra.mxu0 %v2850_v50  ;;  %2451 = vmatpush3.bf16.msra.mxu1 %v2873_v6 }
 0x58b   :  { %2427 = vmatprep.subr.bf16.mxu0 %v2856_v53  ;;  %2452 = vmatprep.subr.bf16.mxu1 %v2734_v0 }
 0x58e   :  { %2429 = vmatpush1.bf16.msra.mxu0 %v2860_v59  ;;  %2454 = vmatpush3.bf16.msra.mxu1 %v2879_v11 }
 0x58f   :  { %2431 = vmatprep.subr.bf16.mxu0 %v2866_v62  ;;  %2455 = vmatprep.subr.bf16.mxu1 %v2734_v0 }
 0x592   :  { %2433 = vmatpush1.bf16.msra.mxu0 %v2870_v4  ;;  %2457 = vmatpush3.bf16.msra.mxu1 %v2885_v14 }
 0x593   :  { %2459 = vmatprep.subr.bf16.mxu0 %v2808_v5  ;;  %2490 = vmatprep.subr.bf16.mxu1 %v2734_v0  ;;  %v967_v5 = vunpack.c.h.bf16 %v3102_v22 }
 0x648   :  { %v1034_v46 = vpop.f32.mrb[10].mxu0  ;;  %v1105_v47 = vpop.f32.mrb[10].mxu1 }
 0x649   :  { %v1109_v48 = vadd.f32 %v1034_v46, %v965_v45  ;;  %v1036_v49 = vpop.f32.mrb[11].mxu0  ;;  %v1960_v51 = vpop.f32.mrb[11].mxu1  ;;  %v1123_v2 = vadd.f32 %v2929_v36, %v1105_v47  ;;  %v1478_v45 = vld [vmem:[#allocation8 + $0x40] sm:$0xff]  ;;  %v1479_v46 = vld [vmem:[#allocation8 + $0x48] sm:$0xff] }
 0x64a   :  { %v1116_v56 = vadd.f32 %v1036_v49, %v966_v55  ;;  %v2527_v47 = vpack.c.bf16 %v1479_v46, %v1478_v45  ;;  %v1481_v49 = vld [vmem:[#allocation8 + $0x58] sm:$0xff]  ;;  %v1483_v55 = vld [vmem:[#allocation8 + $0x68] sm:$0xff] }
 0x64b   :  { %v1591_v54 = vmul.f32 -1.442695, %v1109_v48  ;;  %v1480_v48 = vld [vmem:[#allocation8 + $0x50] sm:$0xff] }
 0x64c   :  { %v1592_v58 = vmul.f32 -1.442695, %v1116_v56  ;;  %v2530_v51 = vpack.c.bf16 %v1481_v49, %v1480_v48 }
 0x64d   :  { %2601 = vpow2.f32 %v1591_v54  ;;  %v1482_v54 = vld [vmem:[#allocation8 + $0x60] sm:$0xff] }
 0x64e   :  { %2603 = vpow2.f32 %v1592_v58  ;;  %v2533_v56 = vpack.c.bf16 %v1483_v55, %v1482_v54  ;;  %v1484_v58 = vld [vmem:[#allocation8 + $0x70] sm:$0xff] }
 0x657   :  { %v2602_v57 = vpop.eup %2601 }
 0x658   :  { %v1113_v60 = vadd.f32 1.0, %v2602_v57  ;;  %v2604_v63 = vpop.eup %2603  ;;  %v1485_v57 = vld [vmem:[#allocation8 + $0x78] sm:$0xff] }
 0x659   :  { %v1120_v12 = vadd.f32 1.0, %v2604_v63  ;;  %v1299_v63 = vld [vmem:[#allocation3 + $0x54] sm:$0xff] }
 0x65a   :  { %2605 = vrcp.f32 %v1113_v60  ;;  %v2536_v60 = vpack.c.bf16 %v1485_v57, %v1484_v58 }
 0x664   :  { %v2606_v3 = vpop.eup %2605 }
 0x665   :  { %v1124_v7 = vmul.f32 %v2606_v3, %v1123_v2 }
 0x667   :  { %v1125_v8 = vadd.f32 %v1124_v7, %v967_v5  ;;  %v1301_v5 = vunpack.c.l.bf16 %v1299_v63 }
 0x669   :  { %2607 = vtanh.f32 %v1125_v8 }
 0x66a   :  { %2609 = vrcp.f32 %v1120_v12 }
 0x673   :  { %v2608_v13 = vpop.eup %2607 }
 0x674   :  { %v1127_v17 = vsub.f32 %v3107_v40, %v2608_v13  ;;  %v2610_v18 = vpop.eup %2609  ;;  %v1476_v40 = vld [vmem:[#allocation8 + $0x30] sm:$0xff] }
 0x676   :  { %v1128_v19 = vmul.f32 %v2610_v18, %v1127_v17  ;;  %v1302_v17 = vunpack.c.h.bf16 %v1299_v63 }
 0x678   :  { %v3149_v20 = vadd.f32 %v2608_v13, %v1128_v19 }
 0x67a   :  { %1201 = vmatmul.mubr.f32.vlgmr.msra.gmra.mrb[12].mxu0 %v3149_v20  ;;  %1994 = vmatmul.mubr.f32.vlgmr.msra.gmra.mrb[12].mxu1 %v3149_v20 }
 0x67b   :  { %2461 = vmatpush1.bf16.msra.mxu0 %v2810_v9  ;;  %2492 = vmatpush3.bf16.msra.mxu1 %v2827_v29  ;;  %v1131_v9 = vld [vmem:[#allocation3 + $0x48] sm:$0xff] }
 0x67c   :  { %2463 = vmatprep.subr.bf16.mxu0 %v2812_v10  ;;  %2493 = vmatprep.subr.bf16.mxu1 %v2734_v0  ;;  %v1133_v10 = vunpack.c.l.bf16 %v1131_v9 }
 0x67d   :  { %1368 = vmatprep.mubr.f32.mxu0 %v2735_v1  ;;  %2028 = vmatprep.mubr.msk.f32.mxu1 %vm2736_vm0, %v2735_v1 }
 0x67f   :  { %2465 = vmatpush1.bf16.msra.mxu0 %v2816_v15  ;;  %2495 = vmatpush3.bf16.msra.mxu1 %v2833_v34  ;;  %v1134_v34 = vunpack.c.h.bf16 %v1131_v9 }
 0x680   :  { %2467 = vmatprep.subr.bf16.mxu0 %v2819_v16  ;;  %2496 = vmatprep.subr.bf16.mxu1 %v2734_v0 }
 0x683   :  { %2469 = vmatpush1.bf16.msra.mxu0 %v2822_v21  ;;  %2498 = vmatpush3.bf16.msra.mxu1 %v2843_v43 }
 0x684   :  { %2471 = vmatprep.subr.bf16.mxu0 %v2825_v23  ;;  %2499 = vmatprep.subr.bf16.mxu1 %v2734_v0 }
 0x687   :  { %2473 = vmatpush1.bf16.msra.mxu0 %v2830_v32  ;;  %2501 = vmatpush3.bf16.msra.mxu1 %v2853_v52 }
 0x688   :  { %2475 = vmatprep.subr.bf16.mxu0 %v2836_v35  ;;  %2502 = vmatprep.subr.bf16.mxu1 %v2734_v0 }
 0x68b   :  { %2477 = vmatpush1.bf16.msra.mxu0 %v2840_v41  ;;  %2504 = vmatpush3.bf16.msra.mxu1 %v2863_v61 }
 0x68c   :  { %2479 = vmatprep.subr.bf16.mxu0 %v2846_v44  ;;  %2505 = vmatprep.subr.bf16.mxu1 %v2734_v0 }
 0x68f   :  { %2481 = vmatpush1.bf16.msra.mxu0 %v2850_v50  ;;  %2507 = vmatpush3.bf16.msra.mxu1 %v2873_v6  ;;  %v3187_v50 = vld [vmem:[#allocation3 + $0x50] ss:$12 sps:$4 sm:$0xff]  }
 0x690   :  { %2483 = vmatprep.subr.bf16.mxu0 %v2856_v53  ;;  %2508 = vmatprep.subr.bf16.mxu1 %v2734_v0  ;;  %v1135_v53 = vunpack.c.l.bf16 %v3187_v50 }
 0x693   :  { %2485 = vmatpush1.bf16.msra.mxu0 %v2860_v59  ;;  %2510 = vmatpush3.bf16.msra.mxu1 %v2879_v11 }
 0x694   :  { %2487 = vmatprep.subr.bf16.mxu0 %v2866_v62  ;;  %2511 = vmatprep.subr.bf16.mxu1 %v2734_v0 }
 0x697   :  { %2489 = vmatpush1.bf16.msra.mxu0 %v2870_v4  ;;  %2513 = vmatpush3.bf16.msra.mxu1 %v2885_v14 }
 0x698   :  { %2514 = vmatprep.subr.bf16.mxu0 %v2734_v0 }
 0x74d   :  { %v1202_v15 = vpop.f32.mrb[12].mxu0  ;;  %v1273_v16 = vpop.f32.mrb[12].mxu1 }
 0x74e   :  { %v1277_v21 = vadd.f32 %v1202_v15, %v1133_v10  ;;  %v1204_v23 = vpop.f32.mrb[13].mxu0  ;;  %v1995_v29 = vpop.f32.mrb[13].mxu1  ;;  %v1291_v59 = vadd.f32 %v2929_v36, %v1273_v16 }
 0x74f   :  { %v1284_v35 = vadd.f32 %v1204_v23, %v1134_v34 }
 0x750   :  { %v1593_v32 = vmul.f32 -1.442695, %v1277_v21 }
 0x751   :  { %v1594_v41 = vmul.f32 -1.442695, %v1284_v35 }
 0x752   :  { %2611 = vpow2.f32 %v1593_v32 }
 0x753   :  { %2613 = vpow2.f32 %v1594_v41 }
 0x75c   :  { %v2612_v43 = vpop.eup %2611 }
 0x75d   :  { %v1281_v44 = vadd.f32 1.0, %v2612_v43  ;;  %v2614_v52 = vpop.eup %2613 }
 0x75e   :  { %v1288_v6 = vadd.f32 1.0, %v2614_v52 }
 0x75f   :  { %2615 = vrcp.f32 %v1281_v44  ;;  %v1597_v44 = vld [vmem:[%s3227_s4] ss:$0 sm:$0xff] }
 0x769   :  { %v2616_v61 = vpop.eup %2615 }
 0x76a   :  { %v1292_v62 = vmul.f32 %v2616_v61, %v1291_v59 }
 0x76c   :  { %v1293_v4 = vadd.f32 %v1292_v62, %v1135_v53 }
 0x76e   :  { %2617 = vtanh.f32 %v1293_v4 }
 0x76f   :  { %2619 = vrcp.f32 %v1288_v6 }
 0x778   :  { %v2618_v11 = vpop.eup %2617 }
 0x779   :  { %v1295_v14 = vsub.f32 %v3149_v20, %v2618_v11  ;;  %v2620_v22 = vpop.eup %2619 }
 0x77b   :  { %v1296_v24 = vmul.f32 %v2620_v22, %v1295_v14 }
 0x77d   :  { %v3192_v25 = vadd.f32 %v2618_v11, %v1296_v24 }
 0x77f   :  { %1369 = vmatmul.mubr.f32.vlgmr.msra.gmra.mrb[14].mxu0 %v3192_v25  ;;  %2029 = vmatmul.mubr.f32.vlgmr.msra.gmra.mrb[14].mxu1 %v3192_v25 }
 0x780   :  { %2063 = vmatprep.mubr.msk.f32.mxu0 %vm2736_vm0, %v2735_v1  ;;  %2516 = vmatpush3.bf16.msra.mxu0 %v2515_v28  ;;  %v1477_v1 = vld [vmem:[#allocation8 + $0x38] sm:$0xff] }
 0x781   :  { %2517 = vmatprep.subr.bf16.mxu0 %v2734_v0  ;;  %v2524_v42 = vpack.c.bf16 %v1477_v1, %v1476_v40 }
 0x784   :  { %2519 = vmatpush3.bf16.msra.mxu0 %v2518_v33 }
 0x785   :  { %2520 = vmatprep.subr.bf16.mxu0 %v2734_v0 }
 0x788   :  { %2522 = vmatpush3.bf16.msra.mxu0 %v2521_v39 }
 0x789   :  { %2523 = vmatprep.subr.bf16.mxu0 %v2734_v0 }
 0x78c   :  { %2525 = vmatpush3.bf16.msra.mxu0 %v2524_v42 }
 0x78d   :  { %2526 = vmatprep.subr.bf16.mxu0 %v2734_v0 }
 0x790   :  { %2528 = vmatpush3.bf16.msra.mxu0 %v2527_v47 }
 0x791   :  { %2529 = vmatprep.subr.bf16.mxu0 %v2734_v0 }
 0x794   :  { %2531 = vmatpush3.bf16.msra.mxu0 %v2530_v51 }
 0x795   :  { %2532 = vmatprep.subr.bf16.mxu0 %v2734_v0 }
 0x798   :  { %2534 = vmatpush3.bf16.msra.mxu0 %v2533_v56 }
 0x799   :  { %2535 = vmatprep.subr.bf16.mxu0 %v2734_v0  ;;  %v1303_v0 = vunpack.c.h.bf16 %v3187_v50 }
 0x79c   :  { %2537 = vmatpush3.bf16.msra.mxu0 %v2536_v60 }
 0x852   :  { %v1370_v2 = vpop.f32.mrb[14].mxu0  ;;  %v1441_v3 = vpop.f32.mrb[14].mxu1 }
 0x853   :  { %v1445_v7 = vadd.f32 %v1370_v2, %v1301_v5  ;;  %v1372_v8 = vpop.f32.mrb[15].mxu0  ;;  %v2030_v12 = vpop.f32.mrb[15].mxu1  ;;  %v1459_v15 = vadd.f32 %v2929_v36, %v1441_v3 }
 0x854   :  { %v1452_v18 = vadd.f32 %v1372_v8, %v1302_v17 }
 0x855   :  { %v1595_v13 = vmul.f32 -1.442695, %v1445_v7 }
 0x856   :  { %v1596_v19 = vmul.f32 -1.442695, %v1452_v18 }
 0x857   :  { %2621 = vpow2.f32 %v1595_v13 }
 0x858   :  { %2623 = vpow2.f32 %v1596_v19 }
 0x861   :  { %v2622_v20 = vpop.eup %2621 }
 0x862   :  { %v1449_v9 = vadd.f32 1.0, %v2622_v20  ;;  %v2624_v10 = vpop.eup %2623 }
 0x863   :  { %v1456_v29 = vadd.f32 1.0, %v2624_v10 }
 0x864   :  { %2625 = vrcp.f32 %v1449_v9 }
 0x86e   :  { %v2626_v16 = vpop.eup %2625 }
 0x86f   :  { %v1460_v21 = vmul.f32 %v2626_v16, %v1459_v15 }
 0x871   :  { %v1461_v23 = vadd.f32 %v1460_v21, %v1303_v0 }
 0x873   :  { %2627 = vtanh.f32 %v1461_v23 }
 0x874   :  { %2629 = vrcp.f32 %v1456_v29 }
 0x87d   :  { %v2628_v32 = vpop.eup %2627 }
 0x87e   :  { %v1463_v34 = vsub.f32 %v3192_v25, %v2628_v32  ;;  %v2630_v35 = vpop.eup %2629 }
 0x880   :  { %v1464_v41 = vmul.f32 %v2630_v35, %v1463_v34 }
 0x882   :  { %v1465_v43 = vadd.f32 %v2628_v32, %v1464_v41 }
 0x884   :  { %2064 = vmatmul.mubr.f32.vlgmr.msra.gmra.mrb[16].mxu0 %v1465_v43 }
 0x957   :  { %v1559_v36 = vpop.f32.mrb[16].mxu0 }
 0x958   :  { %v1560_v50 = vadd.f32 %v1597_v44, %v1559_v36  ;;  %v2065_v52 = vpop.f32.mrb[17].mxu0 }
 0x95a   :  { %1563 = vst [vmem:[#allocation9] sm:$0xff] %v1560_v50 }
 0x95b   :  { %2708 = shalt.err (!%p2705_p0)
}
 0x95c   :  { %s2709_s15 = scalar_lea.hbm %s3228_s5, 128 }
 0x95d   :  { %p2710_p1 = scmp.ne.s32.totalorder %s3228_s5, %s2709_s15  ;;  %p2713_p2 = scmp.lt.u32.totalorder %s2709_s15, %s3228_s5 }
 0x95f   :  { %p2715_p3 = pnand %p2713_p2, %p2710_p1 }
 0x961   :  { %2718 = shalt.err (!%p2715_p3)
}
 0x962   :  { %1573 = dma.vmem_to_hbm [thread:$0]  %s1571_s11, 128, %s3228_s5, [#allocation5]  }
 0x963   :  { %2723 = dma.done.wait [#allocation5], 128  }
 0x964   :  { %2724 = vsyncadd [#allocation5], 4294967168 }
 0x965   :  { %1577 = vsyncpa [#allocation4], 1 }
 0x966   :  { %1578 = vsyncpa [#allocation7], 1 }
 0x967   :  { %1579 = vsyncpa [#allocation5], 1 }

</bundles_post_ra>
